<compile_context>
chip_gen: v5e
topology: v5e:2x2
jax: 0.10.0
libtpu: 0.0.40
codegen_flags: <defaults>
</compile_context>

<pallas_src>
import jax
import jax.numpy as jnp
from jax.experimental import pallas as pl
from jax.experimental.pallas import tpu as pltpu


def _round_up(x, m):
    return ((x + m - 1) // m) * m


def mnist_mlp_kernel(x_ref, w1_ref, b1_ref, w2_ref, b2_ref, w3_ref, b3_ref,
                     out_ref):
    cdt = w1_ref.dtype  # compute dtype of the matmul operands (bf16 or f32)

    # fc1 + relu   (MXU matmul, f32 accumulate; bias-add/ReLU in f32 on VPU)
    h1 = jnp.dot(x_ref[...], w1_ref[...], preferred_element_type=jnp.float32)
    h1 = jnp.maximum(h1 + b1_ref[...], 0.0)

    # fc2 + relu
    h2 = jnp.dot(h1.astype(cdt), w2_ref[...],
                 preferred_element_type=jnp.float32)
    h2 = jnp.maximum(h2 + b2_ref[...], 0.0)

    # fc3 (no activation); output lanes are 128-padded -> unmasked stores.
    h3 = jnp.dot(h2.astype(cdt), w3_ref[...],
                 preferred_element_type=jnp.float32)
    out_ref[...] = (h3 + b3_ref[...]).astype(out_ref.dtype)


def mnist_mlp(x, w1, b1, w2, b2, w3, b3, *, block_b=256,
              compute_dtype=jnp.bfloat16):
    """Forward pass of the MNIST MLP. Returns (B, 10) f32 logits."""
    B, K = x.shape                      # K = 784
    N1 = w1.shape[1]                    # 512
    N2 = w2.shape[1]                    # 512
    N_OUT = w3.shape[1]                 # 10
    K_PAD = _round_up(K, 128)           # 896
    N_OUT_PAD = _round_up(N_OUT, 128)   # 128 (lane-dense output)

    # Zero-pad the fc1 contraction dim and the fc3 output dim.
    x_p = jnp.pad(x, ((0, 0), (0, K_PAD - K)))
    w1_p = jnp.pad(w1, ((0, K_PAD - K), (0, 0)))
    w3_p = jnp.pad(w3, ((0, 0), (0, N_OUT_PAD - N_OUT)))
    b3_p = jnp.pad(b3, ((0, 0), (0, N_OUT_PAD - N_OUT)))

    # Batch tile: TB = block_b for large batches (128-256 fills an MXU pass);
    # for tiny batches pad B up to a multiple of 8 (sublane) and use one tile.
    tb = min(block_b, _round_up(max(B, 8), 8))
    B_pad = _round_up(B, tb)
    if B_pad != B:
        x_p = jnp.pad(x_p, ((0, B_pad - B), (0, 0)))

    # Cast matmul operands to the compute dtype (bf16 halves the resident
    # weight footprint and HBM->VMEM traffic); biases stay f32 for the epilogue.
    x_p = x_p.astype(compute_dtype)
    w1_p = w1_p.astype(compute_dtype)
    w2_c = w2.astype(compute_dtype)
    w3_p = w3_p.astype(compute_dtype)

    grid = (B_pad // tb,)

    # Weights/biases: constant block index -> DMA'd once, resident in VMEM
    # across all batch tiles.
    def resident(a):
        return pl.BlockSpec(a.shape, lambda i: (0, 0))

    cdt_bytes = jnp.dtype(compute_dtype).itemsize
    flops = 2 * B_pad * (K_PAD * N1 + N1 * N2 + N2 * N_OUT_PAD)
    bytes_accessed = (
        B_pad * K_PAD * cdt_bytes                                    # x
        + (K_PAD * N1 + N1 * N2 + N2 * N_OUT_PAD) * cdt_bytes        # weights
        + (N1 + N2 + N_OUT_PAD) * 4                                  # biases
        + B_pad * N_OUT_PAD * 4)                                     # output

    out = pl.pallas_call(
        mnist_mlp_kernel,
        out_shape=jax.ShapeDtypeStruct((B_pad, N_OUT_PAD), jnp.float32),
        grid=grid,
        in_specs=[
            pl.BlockSpec((tb, K_PAD), lambda i: (i, 0)),   # x: tiled over batch
            resident(w1_p), resident(b1),
            resident(w2_c), resident(b2),
            resident(w3_p), resident(b3_p),
        ],
        out_specs=pl.BlockSpec((tb, N_OUT_PAD), lambda i: (i, 0)),
        compiler_params=pltpu.CompilerParams(
            # Batch axis is embarrassingly parallel -> megacore sharding on v7x.
            dimension_semantics=("parallel",),
            # VMEM use is tiny (~1.4 MB weights + double-buffered tiles), well
            # under the default scoped limit on every generation (incl. v7x's
            # 64 MiB physical VMEM), so no vmem_limit_bytes override needed.
        ),
        cost_estimate=pl.CostEstimate(
            flops=flops, transcendentals=0, bytes_accessed=bytes_accessed),
    )(x_p, w1_p, b1, w2_c, b2, w3_p, b3_p)

    return out[:B, :N_OUT]


def init_params(key):
    # Deterministic init mimicking torch.nn.Linear (uniform(-k, k), k=1/sqrt(fan_in)).
    def linear(key, fan_in, fan_out):
        kw, kb = jax.random.split(key)
        bound = 1.0 / jnp.sqrt(fan_in)
        w = jax.random.uniform(kw, (fan_in, fan_out), jnp.float32, -bound, bound)
        b = jax.random.uniform(kb, (1, fan_out), jnp.float32, -bound, bound)
        return w, b

    k1, k2, k3 = jax.random.split(key, 3)
    w1, b1 = linear(k1, 784, 512)
    w2, b2 = linear(k2, 512, 512)
    w3, b3 = linear(k3, 512, 10)
    return w1, b1, w2, b2, w3, b3


if __name__ == "__main__":
    key = jax.random.PRNGKey(0)
    kx, kp = jax.random.split(key)

    B = 8  # small batch for the self-test; the kernel tiles larger batches
    x = jax.random.normal(kx, (B, 784), jnp.float32)
    w1, b1, w2, b2, w3, b3 = init_params(kp)

    # Pure-JAX reference.
    ref = jnp.maximum(x @ w1 + b1, 0.0)
    ref = jnp.maximum(ref @ w2 + b2, 0.0)
    ref = ref @ w3 + b3

    # f32 compute path: tight numerical check.
    out_f32 = jax.block_until_ready(
        mnist_mlp(x, w1, b1, w2, b2, w3, b3, compute_dtype=jnp.float32))
    assert out_f32.shape == (B, 10)
    assert jnp.allclose(out_f32, ref, atol=1e-4, rtol=1e-4)

    # bf16 matmul operands + f32 accumulation: the performance path on v6e/v7x.
    out_bf16 = jax.block_until_ready(
        mnist_mlp(x, w1, b1, w2, b2, w3, b3, compute_dtype=jnp.bfloat16))
    assert out_bf16.shape == (B, 10)
    assert jnp.allclose(out_bf16, ref, atol=1e-1, rtol=1e-1)

    print("KERNEL_OK")
</pallas_src>

<mosaic_0001>
module attributes {stable_mosaic.version = 11 : i64} {
  func.func @mnist_mlp_kernel(%arg0: i32, %arg1: memref<8x896xf32, #tpu.memory_space<vmem>>, %arg2: memref<896x512xf32, #tpu.memory_space<vmem>>, %arg3: memref<1x512xf32, #tpu.memory_space<vmem>>, %arg4: memref<512x512xf32, #tpu.memory_space<vmem>>, %arg5: memref<1x512xf32, #tpu.memory_space<vmem>>, %arg6: memref<512x128xf32, #tpu.memory_space<vmem>>, %arg7: memref<1x128xf32, #tpu.memory_space<vmem>>, %arg8: memref<8x128xf32, #tpu.memory_space<vmem>>) attributes {dimension_semantics = [#tpu.dimension_semantics<parallel>], iteration_bounds = array<i64: 1>, scalar_prefetch = 0 : i64, scratch_operands = 0 : i64, tpu.core_type = #tpu.core_type<tc>, window_params = [{transform_indices = @transform_0, window_bounds = array<i64: 8, 896>}, {pipeline_mode = #tpu.pipeline_mode<synchronous>, transform_indices = @transform_1, window_bounds = array<i64: 896, 512>}, {pipeline_mode = #tpu.pipeline_mode<synchronous>, transform_indices = @transform_2, window_bounds = array<i64: 1, 512>}, {pipeline_mode = #tpu.pipeline_mode<synchronous>, transform_indices = @transform_3, window_bounds = array<i64: 512, 512>}, {pipeline_mode = #tpu.pipeline_mode<synchronous>, transform_indices = @transform_4, window_bounds = array<i64: 1, 512>}, {pipeline_mode = #tpu.pipeline_mode<synchronous>, transform_indices = @transform_5, window_bounds = array<i64: 512, 128>}, {pipeline_mode = #tpu.pipeline_mode<synchronous>, transform_indices = @transform_6, window_bounds = array<i64: 1, 128>}, {transform_indices = @transform_7, window_bounds = array<i64: 8, 128>}]} {
    %c0 = arith.constant 0 : index
    %c0_0 = arith.constant 0 : index
    %0 = vector.load %arg1[%c0, %c0_0] : memref<8x896xf32, #tpu.memory_space<vmem>>, vector<8x896xf32>
    %c0_1 = arith.constant 0 : index
    %c0_2 = arith.constant 0 : index
    %1 = vector.load %arg2[%c0_1, %c0_2] : memref<896x512xf32, #tpu.memory_space<vmem>>, vector<896x512xf32>
    %cst = arith.constant dense<0.000000e+00> : vector<8x512xf32>
    %2 = tpu.matmul %0, %1, %cst {dimension_numbers = #tpu.dot_dimension_numbers<[1], [0], [0], [1], [0, 0, 1, 1], [], []>} : vector<8x896xf32>, vector<896x512xf32>, vector<8x512xf32> -> vector<8x512xf32>
    %c0_3 = arith.constant 0 : index
    %c0_4 = arith.constant 0 : index
    %3 = vector.load %arg3[%c0_3, %c0_4] : memref<1x512xf32, #tpu.memory_space<vmem>>, vector<1x512xf32>
    %4 = vector.broadcast %3 : vector<1x512xf32> to vector<8x512xf32>
    %5 = arith.addf %2, %4 : vector<8x512xf32>
    %cst_5 = arith.constant 0.000000e+00 : f32
    %6 = vector.broadcast %cst_5 : f32 to vector<8x512xf32>
    %7 = arith.maximumf %5, %6 : vector<8x512xf32>
    %c0_6 = arith.constant 0 : index
    %c0_7 = arith.constant 0 : index
    %8 = vector.load %arg4[%c0_6, %c0_7] : memref<512x512xf32, #tpu.memory_space<vmem>>, vector<512x512xf32>
    %cst_8 = arith.constant dense<0.000000e+00> : vector<8x512xf32>
    %9 = tpu.matmul %7, %8, %cst_8 {dimension_numbers = #tpu.dot_dimension_numbers<[1], [0], [0], [1], [0, 0, 1, 1], [], []>} : vector<8x512xf32>, vector<512x512xf32>, vector<8x512xf32> -> vector<8x512xf32>
    %c0_9 = arith.constant 0 : index
    %c0_10 = arith.constant 0 : index
    %10 = vector.load %arg5[%c0_9, %c0_10] : memref<1x512xf32, #tpu.memory_space<vmem>>, vector<1x512xf32>
    %11 = vector.broadcast %10 : vector<1x512xf32> to vector<8x512xf32>
    %12 = arith.addf %9, %11 : vector<8x512xf32>
    %cst_11 = arith.constant 0.000000e+00 : f32
    %13 = vector.broadcast %cst_11 : f32 to vector<8x512xf32>
    %14 = arith.maximumf %12, %13 : vector<8x512xf32>
    %c0_12 = arith.constant 0 : index
    %c0_13 = arith.constant 0 : index
    %15 = vector.load %arg6[%c0_12, %c0_13] : memref<512x128xf32, #tpu.memory_space<vmem>>, vector<512x128xf32>
    %cst_14 = arith.constant dense<0.000000e+00> : vector<8x128xf32>
    %16 = tpu.matmul %14, %15, %cst_14 {dimension_numbers = #tpu.dot_dimension_numbers<[1], [0], [0], [1], [0, 0, 1, 1], [], []>} : vector<8x512xf32>, vector<512x128xf32>, vector<8x128xf32> -> vector<8x128xf32>
    %c0_15 = arith.constant 0 : index
    %c0_16 = arith.constant 0 : index
    %17 = vector.load %arg7[%c0_15, %c0_16] : memref<1x128xf32, #tpu.memory_space<vmem>>, vector<1x128xf32>
    %18 = vector.broadcast %17 : vector<1x128xf32> to vector<8x128xf32>
    %19 = arith.addf %16, %18 : vector<8x128xf32>
    %c0_17 = arith.constant 0 : index
    %c0_18 = arith.constant 0 : index
    %20 = vector.load %arg8[%c0_17, %c0_18] : memref<8x128xf32, #tpu.memory_space<vmem>>, vector<8x128xf32>
    tpu.vector_store %arg8[%c0_17, %c0_18], %19 {strides = array<i32>} : memref<8x128xf32, #tpu.memory_space<vmem>>, vector<8x128xf32>,
    return
  }
  func.func @transform_0(%arg0: i32) -> (i32, i32) {
    %c0_i32 = arith.constant 0 : i32
    %c0_i32_0 = arith.constant 0 : i32
    return %arg0, %c0_i32 : i32, i32
  }
  func.func @transform_1(%arg0: i32) -> (i32, i32) {
    %c0_i32 = arith.constant 0 : i32
    %c0_i32_0 = arith.constant 0 : i32
    %c0_i32_1 = arith.constant 0 : i32
    return %c0_i32, %c0_i32_0 : i32, i32
  }
  func.func @transform_2(%arg0: i32) -> (i32, i32) {
    %c0_i32 = arith.constant 0 : i32
    %c0_i32_0 = arith.constant 0 : i32
    %c0_i32_1 = arith.constant 0 : i32
    return %c0_i32, %c0_i32_0 : i32, i32
  }
  func.func @transform_3(%arg0: i32) -> (i32, i32) {
    %c0_i32 = arith.constant 0 : i32
    %c0_i32_0 = arith.constant 0 : i32
    %c0_i32_1 = arith.constant 0 : i32
    return %c0_i32, %c0_i32_0 : i32, i32
  }
  func.func @transform_4(%arg0: i32) -> (i32, i32) {
    %c0_i32 = arith.constant 0 : i32
    %c0_i32_0 = arith.constant 0 : i32
    %c0_i32_1 = arith.constant 0 : i32
    return %c0_i32, %c0_i32_0 : i32, i32
  }
  func.func @transform_5(%arg0: i32) -> (i32, i32) {
    %c0_i32 = arith.constant 0 : i32
    %c0_i32_0 = arith.constant 0 : i32
    %c0_i32_1 = arith.constant 0 : i32
    return %c0_i32, %c0_i32_0 : i32, i32
  }
  func.func @transform_6(%arg0: i32) -> (i32, i32) {
    %c0_i32 = arith.constant 0 : i32
    %c0_i32_0 = arith.constant 0 : i32
    %c0_i32_1 = arith.constant 0 : i32
    return %c0_i32, %c0_i32_0 : i32, i32
  }
  func.func @transform_7(%arg0: i32) -> (i32, i32) {
    %c0_i32 = arith.constant 0 : i32
    %c0_i32_0 = arith.constant 0 : i32
    return %arg0, %c0_i32 : i32, i32
  }
}

</mosaic_0001>

<bundles_post_ra>
// kernel: tpu_custom_call.1
= control target key start
LH: loop header
LB: loop body
LE: loop exit
PB: predicated region body
PF: predicated region fallthrough
CT: control target
= control target key end

     0   :  { %12 = vsyncpa [#allocation3], 0  ;;  %s2297_s0 = inlined_call_operand.hbm [shape: f32[8,896], index: 0, kind: input, shape index: {}]   ;;  %s2298_s1 = inlined_call_operand.hbm [shape: f32[896,512], index: 1, kind: input, shape index: {}]   ;;  %s2299_s2 = inlined_call_operand.hbm [shape: f32[1,512], index: 2, kind: input, shape index: {}]   ;;  %s2300_s3 = inlined_call_operand.hbm [shape: f32[512,512], index: 3, kind: input, shape index: {}]   ;;  %s2301_s4 = inlined_call_operand.hbm [shape: f32[1,512], index: 4, kind: input, shape index: {}]   ;;  %s2302_s5 = inlined_call_operand.hbm [shape: f32[512,128], index: 5, kind: input, shape index: {}]   ;;  %s2303_s6 = inlined_call_operand.hbm [shape: f32[1,128], index: 6, kind: input, shape index: {}]   ;;  %s2304_s7 = inlined_call_operand.hbm [shape: f32[8,128], index: 7, kind: output, shape index: {}]  }
   0x1   :  { %13 = vsyncpa [#allocation6], 0 }
   0x2   :  { %14 = vsyncpa [#allocation9], 0 }
   0x3   :  { %15 = vsyncpa [#allocation12], 0  ;;  %s32_s26 = sshll.u32 %s2298_s1, 4  ;;  %s33_s26 = int_to_ptr.hbm [resolvable:$true] %s32_s26 }
   0x4   :  { %16 = vsyncpa [#allocation4], 0  ;;  %s2138_s27 = smov [#allocation5]   ;;  %s56_s8 = sshll.u32 %s2300_s3, 4  ;;  %s57_s8 = int_to_ptr.hbm [resolvable:$true] %s56_s8 }
   0x5   :  { %s34_s28 = sshll.u32 %s2138_s27, 4  ;;  %s2139_s9 = smov 512   ;;  %s35_s28 = int_to_ptr.vmem [resolvable:$true] %s34_s28 }
   0x6   :  { %s2140_s10 = smov 32   ;;  %s2141_s11 = smov [#allocation8]  }
   0x7   :  { %40 = dma.hbm_to_vmem [thread:$0]  %s33_s26, 57344, %s35_s28, [#allocation6], %s2139_s9, %s2139_s9, %s2140_s10  }
   0x8   :  { %s58_s12 = sshll.u32 %s2141_s11, 4  ;;  %s80_s15 = sshll.u32 %s2302_s5, 4  ;;  %s59_s12 = int_to_ptr.vmem [resolvable:$true] %s58_s12  ;;  %s81_s15 = int_to_ptr.hbm [resolvable:$true] %s80_s15 }
   0x9   :  { %64 = dma.hbm_to_vmem [thread:$0]  %s57_s8, 32768, %s59_s12, [#allocation9], %s2139_s9, %s2139_s9, %s2140_s10  }
   0xa   :  { %s2142_s1 = smov [#allocation11]   ;;  %s22_s3 = sshll.u32 %s2297_s0, 4  ;;  %s23_s3 = int_to_ptr.hbm [resolvable:$true] %s22_s3 }
   0xb   :  { %s82_s16 = sshll.u32 %s2142_s1, 4  ;;  %s2143_s19 = smov 128   ;;  %s83_s16 = int_to_ptr.vmem [resolvable:$true] %s82_s16 }
   0xc   :  { %s2144_s20 = smov 8   ;;  %s2145_s21 = smov [#allocation2]  }
   0xd   :  { %88 = dma.hbm_to_vmem [thread:$0]  %s81_s15, 8192, %s83_s16, [#allocation12], %s2143_s19, %s2143_s19, %s2144_s20  }
   0xe   :  { %s24_s22 = sshll.u32 %s2145_s21, 4  ;;  %s46_s5 = sshll.u32 %s2299_s2, 4  ;;  %s25_s22 = int_to_ptr.vmem [resolvable:$true] %s24_s22  ;;  %s47_s5 = int_to_ptr.hbm [resolvable:$true] %s46_s5 }
   0xf   :  { %27 = dma.hbm_to_vmem [thread:$0]  %s23_s3, 896, %s25_s22, [#allocation3]  }
  0x10   :  { %s70_s27 = sshll.u32 %s2301_s4, 4  ;;  %s2146_s28 = smov [#allocation7]   ;;  %s71_s27 = int_to_ptr.hbm [resolvable:$true] %s70_s27 }
  0x11   :  { %s48_s29 = sshll.u32 %s2146_s28, 4  ;;  %s2147_s0 = smov [#allocation10]   ;;  %s49_s29 = int_to_ptr.vmem [resolvable:$true] %s48_s29 }
  0x12   :  { %51 = dma.hbm_to_vmem [thread:$0]  %s47_s5, 64, %s49_s29, [#allocation6]  }
  0x13   :  { %s72_s30 = sshll.u32 %s2147_s0, 4  ;;  %s94_s10 = sshll.u32 %s2303_s6, 4  ;;  %s73_s30 = int_to_ptr.vmem [resolvable:$true] %s72_s30  ;;  %s95_s10 = int_to_ptr.hbm [resolvable:$true] %s94_s10 }
  0x14   :  { %75 = dma.hbm_to_vmem [thread:$0]  %s71_s27, 64, %s73_s30, [#allocation9]  }
  0x15   :  { %s2148_s2 = smov [#allocation13]  }
  0x16   :  { %s96_s11 = sshll.u32 %s2148_s2, 4  ;;  %s97_s11 = int_to_ptr.vmem [resolvable:$true] %s96_s11 }
  0x17   :  { %99 = dma.hbm_to_vmem [thread:$0]  %s95_s10, 16, %s97_s11, [#allocation12]  }
  0x18   :  { %2128 = dma.done.wait [#allocation3], 896  }
  0x19   :  { %2129 = vsyncadd [#allocation3], 4294966400 }
  0x1a   :  { %2130 = dma.done.wait [#allocation6], 57408  }
  0x1b   :  { %2131 = vsyncadd [#allocation6], 4294909888 }
  0x1c   :  { %2132 = dma.done.wait [#allocation9], 32832  }
  0x1d   :  { %2133 = vsyncadd [#allocation9], 4294934464 }
  0x1e   :  { %2134 = dma.done.wait [#allocation12], 8208  }
  0x1f   :  { %2135 = vsyncadd [#allocation12], 4294959088  ;;  %v195_v0 = vld [vmem:[#allocation5 + $0x1e0] sm:$0xff]  ;;  %s2149_s4 = smov [#allocation14]   ;;  %s1903_s14 = sshll.u32 %s2304_s7, 4  ;;  %s1904_s14 = int_to_ptr.hbm [resolvable:$true] %s1903_s14 }
  0x20   :  { %v259_v1 = vld [vmem:[#allocation5 + $0x3e0] sm:$0xff]  ;;  %593 = vmatpush.msra.mxu0 %v195_v0  ;;  %s1901_s6 = sshll.u32 %s2149_s4, 4  ;;  %s1902_s6 = int_to_ptr.vmem [resolvable:$true] %s1901_s6 }
  0x21   :  { %v323_v2 = vld [vmem:[#allocation5 + $0x5e0] sm:$0xff]  ;;  %613 = vmatpush.msra.mxu1 %v259_v1 }
  0x22   :  { %v191_v3 = vld [vmem:[#allocation5 + $0x1c0] sm:$0xff]  ;;  %633 = vmatpush.msra.mxu2 %v323_v2 }
  0x23   :  { %v255_v4 = vld [vmem:[#allocation5 + $0x3c0] sm:$0xff]  ;;  %594 = vmatpush.msra.mxu0 %v191_v3 }
  0x24   :  { %v319_v5 = vld [vmem:[#allocation5 + $0x5c0] sm:$0xff]  ;;  %614 = vmatpush.msra.mxu1 %v255_v4 }
  0x25   :  { %v387_v6 = vld [vmem:[#allocation5 + $0x7e0] sm:$0xff]  ;;  %634 = vmatpush.msra.mxu2 %v319_v5 }
  0x26   :  { %v187_v7 = vld [vmem:[#allocation5 + $0x1a0] sm:$0xff]  ;;  %653 = vmatpush.msra.mxu3 %v387_v6  ;;  %v196_v6 = vld [vmem:[#allocation5 + $0x1e8] sm:$0xff] }
  0x27   :  { %v251_v8 = vld [vmem:[#allocation5 + $0x3a0] sm:$0xff]  ;;  %595 = vmatpush.msra.mxu0 %v187_v7 }
  0x28   :  { %v315_v9 = vld [vmem:[#allocation5 + $0x5a0] sm:$0xff]  ;;  %615 = vmatpush.msra.mxu1 %v251_v8 }
  0x29   :  { %v383_v10 = vld [vmem:[#allocation5 + $0x7c0] sm:$0xff]  ;;  %635 = vmatpush.msra.mxu2 %v315_v9 }
  0x2a   :  { %v183_v11 = vld [vmem:[#allocation5 + $0x180] sm:$0xff]  ;;  %654 = vmatpush.msra.mxu3 %v383_v10  ;;  %v192_v10 = vld [vmem:[#allocation5 + $0x1c8] sm:$0xff] }
  0x2b   :  { %v247_v12 = vld [vmem:[#allocation5 + $0x380] sm:$0xff]  ;;  %596 = vmatpush.msra.mxu0 %v183_v11 }
  0x2c   :  { %v311_v13 = vld [vmem:[#allocation5 + $0x580] sm:$0xff]  ;;  %616 = vmatpush.msra.mxu1 %v247_v12 }
  0x2d   :  { %v379_v14 = vld [vmem:[#allocation5 + $0x7a0] sm:$0xff]  ;;  %636 = vmatpush.msra.mxu2 %v311_v13 }
  0x2e   :  { %v179_v15 = vld [vmem:[#allocation5 + $0x160] sm:$0xff]  ;;  %655 = vmatpush.msra.mxu3 %v379_v14  ;;  %v188_v14 = vld [vmem:[#allocation5 + $0x1a8] sm:$0xff] }
  0x2f   :  { %v243_v16 = vld [vmem:[#allocation5 + $0x360] sm:$0xff]  ;;  %597 = vmatpush.msra.mxu0 %v179_v15 }
  0x30   :  { %v307_v17 = vld [vmem:[#allocation5 + $0x560] sm:$0xff]  ;;  %617 = vmatpush.msra.mxu1 %v243_v16 }
  0x31   :  { %v375_v18 = vld [vmem:[#allocation5 + $0x780] sm:$0xff]  ;;  %637 = vmatpush.msra.mxu2 %v307_v17 }
  0x32   :  { %v175_v19 = vld [vmem:[#allocation5 + $0x140] sm:$0xff]  ;;  %656 = vmatpush.msra.mxu3 %v375_v18  ;;  %v184_v18 = vld [vmem:[#allocation5 + $0x188] sm:$0xff] }
  0x33   :  { %v239_v20 = vld [vmem:[#allocation5 + $0x340] sm:$0xff]  ;;  %598 = vmatpush.msra.mxu0 %v175_v19 }
  0x34   :  { %v303_v21 = vld [vmem:[#allocation5 + $0x540] sm:$0xff]  ;;  %618 = vmatpush.msra.mxu1 %v239_v20 }
  0x35   :  { %v371_v22 = vld [vmem:[#allocation5 + $0x760] sm:$0xff]  ;;  %638 = vmatpush.msra.mxu2 %v303_v21 }
  0x36   :  { %v171_v23 = vld [vmem:[#allocation5 + $0x120] sm:$0xff]  ;;  %657 = vmatpush.msra.mxu3 %v371_v22  ;;  %v180_v22 = vld [vmem:[#allocation5 + $0x168] sm:$0xff] }
  0x37   :  { %v235_v24 = vld [vmem:[#allocation5 + $0x320] sm:$0xff]  ;;  %599 = vmatpush.msra.mxu0 %v171_v23 }
  0x38   :  { %v299_v25 = vld [vmem:[#allocation5 + $0x520] sm:$0xff]  ;;  %619 = vmatpush.msra.mxu1 %v235_v24 }
  0x39   :  { %v367_v26 = vld [vmem:[#allocation5 + $0x740] sm:$0xff]  ;;  %639 = vmatpush.msra.mxu2 %v299_v25 }
  0x3a   :  { %v167_v27 = vld [vmem:[#allocation5 + $0x100] sm:$0xff]  ;;  %658 = vmatpush.msra.mxu3 %v367_v26  ;;  %v176_v26 = vld [vmem:[#allocation5 + $0x148] sm:$0xff] }
  0x3b   :  { %v231_v28 = vld [vmem:[#allocation5 + $0x300] sm:$0xff]  ;;  %600 = vmatpush.msra.mxu0 %v167_v27 }
  0x3c   :  { %v295_v29 = vld [vmem:[#allocation5 + $0x500] sm:$0xff]  ;;  %620 = vmatpush.msra.mxu1 %v231_v28 }
  0x3d   :  { %v363_v30 = vld [vmem:[#allocation5 + $0x720] sm:$0xff]  ;;  %640 = vmatpush.msra.mxu2 %v295_v29 }
  0x3e   :  { %v163_v31 = vld [vmem:[#allocation5 + $0xe0] sm:$0xff]  ;;  %659 = vmatpush.msra.mxu3 %v363_v30  ;;  %v172_v30 = vld [vmem:[#allocation5 + $0x128] sm:$0xff] }
  0x3f   :  { %v227_v32 = vld [vmem:[#allocation5 + $0x2e0] sm:$0xff]  ;;  %601 = vmatpush.msra.mxu0 %v163_v31 }
  0x40   :  { %v291_v33 = vld [vmem:[#allocation5 + $0x4e0] sm:$0xff]  ;;  %621 = vmatpush.msra.mxu1 %v227_v32 }
  0x41   :  { %v359_v34 = vld [vmem:[#allocation5 + $0x700] sm:$0xff]  ;;  %641 = vmatpush.msra.mxu2 %v291_v33 }
  0x42   :  { %v159_v35 = vld [vmem:[#allocation5 + $0xc0] sm:$0xff]  ;;  %660 = vmatpush.msra.mxu3 %v359_v34  ;;  %v168_v34 = vld [vmem:[#allocation5 + $0x108] sm:$0xff] }
  0x43   :  { %v223_v36 = vld [vmem:[#allocation5 + $0x2c0] sm:$0xff]  ;;  %602 = vmatpush.msra.mxu0 %v159_v35 }
  0x44   :  { %v287_v37 = vld [vmem:[#allocation5 + $0x4c0] sm:$0xff]  ;;  %622 = vmatpush.msra.mxu1 %v223_v36 }
  0x45   :  { %v355_v38 = vld [vmem:[#allocation5 + $0x6e0] sm:$0xff]  ;;  %642 = vmatpush.msra.mxu2 %v287_v37 }
  0x46   :  { %v155_v39 = vld [vmem:[#allocation5 + $0xa0] sm:$0xff]  ;;  %661 = vmatpush.msra.mxu3 %v355_v38  ;;  %v164_v38 = vld [vmem:[#allocation5 + $0xe8] sm:$0xff] }
  0x47   :  { %v219_v40 = vld [vmem:[#allocation5 + $0x2a0] sm:$0xff]  ;;  %603 = vmatpush.msra.mxu0 %v155_v39 }
  0x48   :  { %v283_v41 = vld [vmem:[#allocation5 + $0x4a0] sm:$0xff]  ;;  %623 = vmatpush.msra.mxu1 %v219_v40 }
  0x49   :  { %v351_v42 = vld [vmem:[#allocation5 + $0x6c0] sm:$0xff]  ;;  %643 = vmatpush.msra.mxu2 %v283_v41 }
  0x4a   :  { %v151_v43 = vld [vmem:[#allocation5 + $0x80] sm:$0xff]  ;;  %662 = vmatpush.msra.mxu3 %v351_v42  ;;  %v160_v42 = vld [vmem:[#allocation5 + $0xc8] sm:$0xff] }
  0x4b   :  { %v215_v44 = vld [vmem:[#allocation5 + $0x280] sm:$0xff]  ;;  %604 = vmatpush.msra.mxu0 %v151_v43 }
  0x4c   :  { %v279_v45 = vld [vmem:[#allocation5 + $0x480] sm:$0xff]  ;;  %624 = vmatpush.msra.mxu1 %v215_v44 }
  0x4d   :  { %v347_v46 = vld [vmem:[#allocation5 + $0x6a0] sm:$0xff]  ;;  %644 = vmatpush.msra.mxu2 %v279_v45 }
  0x4e   :  { %v147_v47 = vld [vmem:[#allocation5 + $0x60] sm:$0xff]  ;;  %663 = vmatpush.msra.mxu3 %v347_v46  ;;  %v156_v46 = vld [vmem:[#allocation5 + $0xa8] sm:$0xff] }
  0x4f   :  { %v211_v48 = vld [vmem:[#allocation5 + $0x260] sm:$0xff]  ;;  %605 = vmatpush.msra.mxu0 %v147_v47 }
  0x50   :  { %v275_v49 = vld [vmem:[#allocation5 + $0x460] sm:$0xff]  ;;  %625 = vmatpush.msra.mxu1 %v211_v48 }
  0x51   :  { %v343_v50 = vld [vmem:[#allocation5 + $0x680] sm:$0xff]  ;;  %645 = vmatpush.msra.mxu2 %v275_v49 }
  0x52   :  { %v143_v51 = vld [vmem:[#allocation5 + $0x40] sm:$0xff]  ;;  %664 = vmatpush.msra.mxu3 %v343_v50  ;;  %v152_v50 = vld [vmem:[#allocation5 + $0x88] sm:$0xff] }
  0x53   :  { %v207_v52 = vld [vmem:[#allocation5 + $0x240] sm:$0xff]  ;;  %606 = vmatpush.msra.mxu0 %v143_v51 }
  0x54   :  { %v271_v53 = vld [vmem:[#allocation5 + $0x440] sm:$0xff]  ;;  %626 = vmatpush.msra.mxu1 %v207_v52 }
  0x55   :  { %v339_v54 = vld [vmem:[#allocation5 + $0x660] sm:$0xff]  ;;  %646 = vmatpush.msra.mxu2 %v271_v53 }
  0x56   :  { %v139_v55 = vld [vmem:[#allocation5 + $0x20] sm:$0xff]  ;;  %665 = vmatpush.msra.mxu3 %v339_v54  ;;  %v148_v54 = vld [vmem:[#allocation5 + $0x68] sm:$0xff] }
  0x57   :  { %v203_v56 = vld [vmem:[#allocation5 + $0x220] sm:$0xff]  ;;  %607 = vmatpush.msra.mxu0 %v139_v55 }
  0x58   :  { %v267_v57 = vld [vmem:[#allocation5 + $0x420] sm:$0xff]  ;;  %627 = vmatpush.msra.mxu1 %v203_v56 }
  0x59   :  { %v335_v58 = vld [vmem:[#allocation5 + $0x640] sm:$0xff]  ;;  %647 = vmatpush.msra.mxu2 %v267_v57 }
  0x5a   :  { %v135_v59 = vld [vmem:[#allocation5] sm:$0xff]  ;;  %666 = vmatpush.msra.mxu3 %v335_v58  ;;  %v144_v58 = vld [vmem:[#allocation5 + $0x48] sm:$0xff] }
  0x5b   :  { %v199_v60 = vld [vmem:[#allocation5 + $0x200] sm:$0xff]  ;;  %608 = vmatpush.msra.mxu0 %v135_v59 }
  0x5c   :  { %v263_v61 = vld [vmem:[#allocation5 + $0x400] sm:$0xff]  ;;  %628 = vmatpush.msra.mxu1 %v199_v60 }
  0x5d   :  { %v331_v62 = vld [vmem:[#allocation5 + $0x620] sm:$0xff]  ;;  %648 = vmatpush.msra.mxu2 %v263_v61 }
  0x5e   :  { %v451_v63 = vld [vmem:[#allocation5 + $0x9e0] sm:$0xff]  ;;  %667 = vmatpush.msra.mxu3 %v331_v62  ;;  %v140_v62 = vld [vmem:[#allocation5 + $0x28] sm:$0xff] }
  0x5f   :  { %v515_v0 = vld [vmem:[#allocation5 + $0xbe0] sm:$0xff]  ;;  %673 = vmatpush.msrb.mxu0 %v451_v63  ;;  %v2211_v63 = vld [vmem:[#allocation2] sm:$0xff] }
  0x60   :  { %v579_v1 = vld [vmem:[#allocation5 + $0xde0] sm:$0xff]  ;;  %693 = vmatpush.msrb.mxu1 %v515_v0  ;;  %v2213_v0 = vld [vmem:[#allocation2 + $0x8] sm:$0xff]  ;;  %609 = vmatmul.f32.vlgmr.msra.gmra.mxu0 %v2211_v63 }
  0x61   :  { %v327_v2 = vld [vmem:[#allocation5 + $0x600] sm:$0xff]  ;;  %713 = vmatpush.msrb.mxu2 %v579_v1  ;;  %v2215_v1 = vld [vmem:[#allocation2 + $0x10] sm:$0xff]  ;;  %629 = vmatmul.f32.vlgmr.msra.gmra.mxu1 %v2213_v0 }
  0x62   :  { %v447_v3 = vld [vmem:[#allocation5 + $0x9c0] sm:$0xff]  ;;  %668 = vmatpush.msra.mxu3 %v327_v2  ;;  %v260_v2 = vld [vmem:[#allocation5 + $0x3e8] sm:$0xff]  ;;  %649 = vmatmul.f32.vlgmr.msra.gmra.mxu2 %v2215_v1 }
  0x63   :  { %v511_v4 = vld [vmem:[#allocation5 + $0xbc0] sm:$0xff]  ;;  %674 = vmatpush.msrb.mxu0 %v447_v3  ;;  %v324_v3 = vld [vmem:[#allocation5 + $0x5e8] sm:$0xff] }
  0x64   :  { %v575_v5 = vld [vmem:[#allocation5 + $0xdc0] sm:$0xff]  ;;  %694 = vmatpush.msrb.mxu1 %v511_v4  ;;  %733 = vmatpush.msrb.mxu3 %v196_v6  ;;  %v388_v4 = vld [vmem:[#allocation5 + $0x7e8] sm:$0xff] }
  0x65   :  { %v443_v7 = vld [vmem:[#allocation5 + $0x9a0] sm:$0xff]  ;;  %714 = vmatpush.msrb.mxu2 %v575_v5  ;;  %v136_v5 = vld [vmem:[#allocation5 + $0x8] sm:$0xff] }
  0x66   :  { %v507_v8 = vld [vmem:[#allocation5 + $0xba0] sm:$0xff]  ;;  %675 = vmatpush.msrb.mxu0 %v443_v7  ;;  %734 = vmatpush.msrb.mxu3 %v192_v10  ;;  %v256_v6 = vld [vmem:[#allocation5 + $0x3c8] sm:$0xff] }
  0x67   :  { %v571_v9 = vld [vmem:[#allocation5 + $0xda0] sm:$0xff]  ;;  %695 = vmatpush.msrb.mxu1 %v507_v8  ;;  %v320_v8 = vld [vmem:[#allocation5 + $0x5c8] sm:$0xff] }
  0x68   :  { %v439_v11 = vld [vmem:[#allocation5 + $0x980] sm:$0xff]  ;;  %715 = vmatpush.msrb.mxu2 %v571_v9  ;;  %735 = vmatpush.msrb.mxu3 %v188_v14  ;;  %v384_v9 = vld [vmem:[#allocation5 + $0x7c8] sm:$0xff] }
  0x69   :  { %v503_v12 = vld [vmem:[#allocation5 + $0xb80] sm:$0xff]  ;;  %676 = vmatpush.msrb.mxu0 %v439_v11  ;;  %v452_v10 = vld [vmem:[#allocation5 + $0x9e8] sm:$0xff] }
  0x6a   :  { %v567_v13 = vld [vmem:[#allocation5 + $0xd80] sm:$0xff]  ;;  %696 = vmatpush.msrb.mxu1 %v503_v12  ;;  %736 = vmatpush.msrb.mxu3 %v184_v18  ;;  %v252_v11 = vld [vmem:[#allocation5 + $0x3a8] sm:$0xff] }
  0x6b   :  { %v435_v15 = vld [vmem:[#allocation5 + $0x960] sm:$0xff]  ;;  %716 = vmatpush.msrb.mxu2 %v567_v13  ;;  %v316_v12 = vld [vmem:[#allocation5 + $0x5a8] sm:$0xff] }
  0x6c   :  { %v499_v16 = vld [vmem:[#allocation5 + $0xb60] sm:$0xff]  ;;  %677 = vmatpush.msrb.mxu0 %v435_v15  ;;  %737 = vmatpush.msrb.mxu3 %v180_v22  ;;  %v380_v13 = vld [vmem:[#allocation5 + $0x7a8] sm:$0xff] }
  0x6d   :  { %v563_v17 = vld [vmem:[#allocation5 + $0xd60] sm:$0xff]  ;;  %697 = vmatpush.msrb.mxu1 %v499_v16  ;;  %v448_v14 = vld [vmem:[#allocation5 + $0x9c8] sm:$0xff] }
  0x6e   :  { %v431_v19 = vld [vmem:[#allocation5 + $0x940] sm:$0xff]  ;;  %717 = vmatpush.msrb.mxu2 %v563_v17  ;;  %738 = vmatpush.msrb.mxu3 %v176_v26  ;;  %v248_v15 = vld [vmem:[#allocation5 + $0x388] sm:$0xff] }
  0x6f   :  { %v495_v20 = vld [vmem:[#allocation5 + $0xb40] sm:$0xff]  ;;  %678 = vmatpush.msrb.mxu0 %v431_v19  ;;  %v312_v16 = vld [vmem:[#allocation5 + $0x588] sm:$0xff]  ;;  %v2223_v19 = vld [vmem:[#allocation2 + $0x30] sm:$0xff] }
  0x70   :  { %v559_v21 = vld [vmem:[#allocation5 + $0xd40] sm:$0xff]  ;;  %698 = vmatpush.msrb.mxu1 %v495_v20  ;;  %739 = vmatpush.msrb.mxu3 %v172_v30  ;;  %v376_v17 = vld [vmem:[#allocation5 + $0x788] sm:$0xff] }
  0x71   :  { %v427_v23 = vld [vmem:[#allocation5 + $0x920] sm:$0xff]  ;;  %718 = vmatpush.msrb.mxu2 %v559_v21  ;;  %v444_v18 = vld [vmem:[#allocation5 + $0x9a8] sm:$0xff] }
  0x72   :  { %v491_v24 = vld [vmem:[#allocation5 + $0xb20] sm:$0xff]  ;;  %679 = vmatpush.msrb.mxu0 %v427_v23  ;;  %740 = vmatpush.msrb.mxu3 %v168_v34  ;;  %v244_v20 = vld [vmem:[#allocation5 + $0x368] sm:$0xff] }
  0x73   :  { %v555_v25 = vld [vmem:[#allocation5 + $0xd20] sm:$0xff]  ;;  %699 = vmatpush.msrb.mxu1 %v491_v24  ;;  %v308_v21 = vld [vmem:[#allocation5 + $0x568] sm:$0xff] }
  0x74   :  { %v423_v27 = vld [vmem:[#allocation5 + $0x900] sm:$0xff]  ;;  %719 = vmatpush.msrb.mxu2 %v555_v25  ;;  %741 = vmatpush.msrb.mxu3 %v164_v38  ;;  %v372_v22 = vld [vmem:[#allocation5 + $0x768] sm:$0xff] }
  0x75   :  { %v487_v28 = vld [vmem:[#allocation5 + $0xb00] sm:$0xff]  ;;  %680 = vmatpush.msrb.mxu0 %v423_v27  ;;  %v440_v23 = vld [vmem:[#allocation5 + $0x988] sm:$0xff] }
  0x76   :  { %v551_v29 = vld [vmem:[#allocation5 + $0xd00] sm:$0xff]  ;;  %700 = vmatpush.msrb.mxu1 %v487_v28  ;;  %742 = vmatpush.msrb.mxu3 %v160_v42  ;;  %v2225_v24 = vld [vmem:[#allocation2 + $0x20] sm:$0xff] }
  0x77   :  { %v419_v31 = vld [vmem:[#allocation5 + $0x8e0] sm:$0xff]  ;;  %720 = vmatpush.msrb.mxu2 %v551_v29  ;;  %v240_v25 = vld [vmem:[#allocation5 + $0x348] sm:$0xff]  ;;  %v2229_v29 = vld [vmem:[#allocation2 + $0x28] sm:$0xff] }
  0x78   :  { %v483_v32 = vld [vmem:[#allocation5 + $0xae0] sm:$0xff]  ;;  %681 = vmatpush.msrb.mxu0 %v419_v31  ;;  %743 = vmatpush.msrb.mxu3 %v156_v46  ;;  %v304_v26 = vld [vmem:[#allocation5 + $0x548] sm:$0xff] }
  0x79   :  { %v547_v33 = vld [vmem:[#allocation5 + $0xce0] sm:$0xff]  ;;  %701 = vmatpush.msrb.mxu1 %v483_v32  ;;  %v368_v27 = vld [vmem:[#allocation5 + $0x748] sm:$0xff] }
  0x7a   :  { %v415_v35 = vld [vmem:[#allocation5 + $0x8c0] sm:$0xff]  ;;  %721 = vmatpush.msrb.mxu2 %v547_v33  ;;  %744 = vmatpush.msrb.mxu3 %v152_v50  ;;  %v436_v28 = vld [vmem:[#allocation5 + $0x968] sm:$0xff] }
  0x7b   :  { %v479_v36 = vld [vmem:[#allocation5 + $0xac0] sm:$0xff]  ;;  %682 = vmatpush.msrb.mxu0 %v415_v35  ;;  %v236_v30 = vld [vmem:[#allocation5 + $0x328] sm:$0xff] }
  0x7c   :  { %v543_v37 = vld [vmem:[#allocation5 + $0xcc0] sm:$0xff]  ;;  %702 = vmatpush.msrb.mxu1 %v479_v36  ;;  %745 = vmatpush.msrb.mxu3 %v148_v54  ;;  %v300_v31 = vld [vmem:[#allocation5 + $0x528] sm:$0xff] }
  0x7d   :  { %v411_v39 = vld [vmem:[#allocation5 + $0x8a0] sm:$0xff]  ;;  %722 = vmatpush.msrb.mxu2 %v543_v37  ;;  %v364_v32 = vld [vmem:[#allocation5 + $0x728] sm:$0xff] }
  0x7e   :  { %v475_v40 = vld [vmem:[#allocation5 + $0xaa0] sm:$0xff]  ;;  %683 = vmatpush.msrb.mxu0 %v411_v39  ;;  %746 = vmatpush.msrb.mxu3 %v144_v58  ;;  %v432_v33 = vld [vmem:[#allocation5 + $0x948] sm:$0xff] }
  0x7f   :  { %v539_v41 = vld [vmem:[#allocation5 + $0xca0] sm:$0xff]  ;;  %703 = vmatpush.msrb.mxu1 %v475_v40  ;;  %v232_v34 = vld [vmem:[#allocation5 + $0x308] sm:$0xff] }
  0x80   :  { %v407_v43 = vld [vmem:[#allocation5 + $0x880] sm:$0xff]  ;;  %723 = vmatpush.msrb.mxu2 %v539_v41  ;;  %747 = vmatpush.msrb.mxu3 %v140_v62  ;;  %v296_v35 = vld [vmem:[#allocation5 + $0x508] sm:$0xff] }
  0x81   :  { %v471_v44 = vld [vmem:[#allocation5 + $0xa80] sm:$0xff]  ;;  %684 = vmatpush.msrb.mxu0 %v407_v43  ;;  %v360_v36 = vld [vmem:[#allocation5 + $0x708] sm:$0xff] }
  0x82   :  { %v535_v45 = vld [vmem:[#allocation5 + $0xc80] sm:$0xff]  ;;  %704 = vmatpush.msrb.mxu1 %v471_v44  ;;  %748 = vmatpush.msrb.mxu3 %v136_v5  ;;  %v428_v37 = vld [vmem:[#allocation5 + $0x928] sm:$0xff] }
  0x83   :  { %v403_v47 = vld [vmem:[#allocation5 + $0x860] sm:$0xff]  ;;  %724 = vmatpush.msrb.mxu2 %v535_v45  ;;  %v228_v38 = vld [vmem:[#allocation5 + $0x2e8] sm:$0xff] }
  0x84   :  { %v467_v48 = vld [vmem:[#allocation5 + $0xa60] sm:$0xff]  ;;  %685 = vmatpush.msrb.mxu0 %v403_v47  ;;  %v292_v39 = vld [vmem:[#allocation5 + $0x4e8] sm:$0xff] }
  0x85   :  { %v531_v49 = vld [vmem:[#allocation5 + $0xc60] sm:$0xff]  ;;  %705 = vmatpush.msrb.mxu1 %v467_v48  ;;  %v356_v40 = vld [vmem:[#allocation5 + $0x6e8] sm:$0xff] }
  0x86   :  { %v399_v51 = vld [vmem:[#allocation5 + $0x840] sm:$0xff]  ;;  %725 = vmatpush.msrb.mxu2 %v531_v49  ;;  %v424_v41 = vld [vmem:[#allocation5 + $0x908] sm:$0xff] }
  0x87   :  { %v463_v52 = vld [vmem:[#allocation5 + $0xa40] sm:$0xff]  ;;  %686 = vmatpush.msrb.mxu0 %v399_v51  ;;  %v224_v42 = vld [vmem:[#allocation5 + $0x2c8] sm:$0xff] }
  0x88   :  { %v527_v53 = vld [vmem:[#allocation5 + $0xc40] sm:$0xff]  ;;  %706 = vmatpush.msrb.mxu1 %v463_v52  ;;  %v288_v43 = vld [vmem:[#allocation5 + $0x4c8] sm:$0xff] }
  0x89   :  { %v395_v55 = vld [vmem:[#allocation5 + $0x820] sm:$0xff]  ;;  %726 = vmatpush.msrb.mxu2 %v527_v53  ;;  %v352_v44 = vld [vmem:[#allocation5 + $0x6c8] sm:$0xff] }
  0x8a   :  { %v459_v56 = vld [vmem:[#allocation5 + $0xa20] sm:$0xff]  ;;  %687 = vmatpush.msrb.mxu0 %v395_v55  ;;  %v420_v45 = vld [vmem:[#allocation5 + $0x8e8] sm:$0xff] }
  0x8b   :  { %v523_v57 = vld [vmem:[#allocation5 + $0xc20] sm:$0xff]  ;;  %707 = vmatpush.msrb.mxu1 %v459_v56  ;;  %v220_v46 = vld [vmem:[#allocation5 + $0x2a8] sm:$0xff] }
  0x8c   :  { %v391_v59 = vld [vmem:[#allocation5 + $0x800] sm:$0xff]  ;;  %727 = vmatpush.msrb.mxu2 %v523_v57  ;;  %v284_v47 = vld [vmem:[#allocation5 + $0x4a8] sm:$0xff] }
  0x8d   :  { %v455_v60 = vld [vmem:[#allocation5 + $0xa00] sm:$0xff]  ;;  %688 = vmatpush.msrb.mxu0 %v391_v59  ;;  %v348_v48 = vld [vmem:[#allocation5 + $0x6a8] sm:$0xff] }
  0x8e   :  { %v519_v61 = vld [vmem:[#allocation5 + $0xc00] sm:$0xff]  ;;  %708 = vmatpush.msrb.mxu1 %v455_v60  ;;  %689 = vmatmul.f32.vlgmr.msrb.gmra.mxu0 %v2225_v24  ;;  %v416_v49 = vld [vmem:[#allocation5 + $0x8c8] sm:$0xff] }
  0x8f   :  { %728 = vmatpush.msrb.mxu2 %v519_v61  ;;  %753 = vmatpush.msra.mxu0 %v260_v2  ;;  %v2220_v7 = vld [vmem:[#allocation2 + $0x18] sm:$0xff]  ;;  %v216_v50 = vld [vmem:[#allocation5 + $0x288] sm:$0xff] }
  0x90   :  { %773 = vmatpush.msra.mxu1 %v324_v3  ;;  %669 = vmatmul.f32.vlgmr.msra.gmra.mxu3 %v2220_v7  ;;  %v280_v51 = vld [vmem:[#allocation5 + $0x488] sm:$0xff] }
  0x91   :  { %793 = vmatpush.msra.mxu2 %v388_v4  ;;  %754 = vmatpush.msra.mxu0 %v256_v6  ;;  %v344_v52 = vld [vmem:[#allocation5 + $0x688] sm:$0xff] }
  0x92   :  { %774 = vmatpush.msra.mxu1 %v320_v8  ;;  %813 = vmatpush.msra.mxu3 %v452_v10  ;;  %v412_v53 = vld [vmem:[#allocation5 + $0x8a8] sm:$0xff] }
  0x93   :  { %794 = vmatpush.msra.mxu2 %v384_v9  ;;  %755 = vmatpush.msra.mxu0 %v252_v11  ;;  %v212_v54 = vld [vmem:[#allocation5 + $0x268] sm:$0xff] }
  0x94   :  { %775 = vmatpush.msra.mxu1 %v316_v12  ;;  %814 = vmatpush.msra.mxu3 %v448_v14  ;;  %v276_v55 = vld [vmem:[#allocation5 + $0x468] sm:$0xff]  ;;  %v197_v12 = vld [vmem:[#allocation5 + $0x1f0] sm:$0xff] }
  0x95   :  { %795 = vmatpush.msra.mxu2 %v380_v13  ;;  %756 = vmatpush.msra.mxu0 %v248_v15  ;;  %v340_v56 = vld [vmem:[#allocation5 + $0x668] sm:$0xff] }
  0x96   :  { %776 = vmatpush.msra.mxu1 %v312_v16  ;;  %815 = vmatpush.msra.mxu3 %v444_v18  ;;  %v408_v57 = vld [vmem:[#allocation5 + $0x888] sm:$0xff]  ;;  %v193_v16 = vld [vmem:[#allocation5 + $0x1d0] sm:$0xff] }
  0x97   :  { %796 = vmatpush.msra.mxu2 %v376_v17  ;;  %757 = vmatpush.msra.mxu0 %v244_v20  ;;  %v208_v58 = vld [vmem:[#allocation5 + $0x248] sm:$0xff]  ;;  %v261_v17 = vld [vmem:[#allocation5 + $0x3f0] sm:$0xff] }
  0x98   :  { %729 = vmatmul.f32.vlgmr.msrb.gmra.mxu2 %v2223_v19  ;;  %777 = vmatpush.msra.mxu1 %v308_v21  ;;  %v272_v59 = vld [vmem:[#allocation5 + $0x448] sm:$0xff]  ;;  %v189_v21 = vld [vmem:[#allocation5 + $0x1b0] sm:$0xff] }
  0x99   :  { %797 = vmatpush.msra.mxu2 %v372_v22  ;;  %816 = vmatpush.msra.mxu3 %v440_v23  ;;  %v336_v60 = vld [vmem:[#allocation5 + $0x648] sm:$0xff]  ;;  %v257_v22 = vld [vmem:[#allocation5 + $0x3d0] sm:$0xff] }
  0x9a   :  { %758 = vmatpush.msra.mxu0 %v240_v25  ;;  %778 = vmatpush.msra.mxu1 %v304_v26  ;;  %v404_v61 = vld [vmem:[#allocation5 + $0x868] sm:$0xff]  ;;  %v185_v26 = vld [vmem:[#allocation5 + $0x190] sm:$0xff] }
  0x9b   :  { %798 = vmatpush.msra.mxu2 %v368_v27  ;;  %817 = vmatpush.msra.mxu3 %v436_v28  ;;  %v204_v62 = vld [vmem:[#allocation5 + $0x228] sm:$0xff]  ;;  %v253_v27 = vld [vmem:[#allocation5 + $0x3b0] sm:$0xff] }
  0x9c   :  { %709 = vmatmul.f32.vlgmr.msrb.gmra.mxu1 %v2229_v29  ;;  %759 = vmatpush.msra.mxu0 %v236_v30  ;;  %v268_v2 = vld [vmem:[#allocation5 + $0x428] sm:$0xff] }
  0x9d   :  { %779 = vmatpush.msra.mxu1 %v300_v31  ;;  %799 = vmatpush.msra.mxu2 %v364_v32  ;;  %v332_v3 = vld [vmem:[#allocation5 + $0x628] sm:$0xff]  ;;  %v181_v31 = vld [vmem:[#allocation5 + $0x170] sm:$0xff] }
  0x9e   :  { %818 = vmatpush.msra.mxu3 %v432_v33  ;;  %760 = vmatpush.msra.mxu0 %v232_v34  ;;  %v400_v4 = vld [vmem:[#allocation5 + $0x848] sm:$0xff]  ;;  %v249_v32 = vld [vmem:[#allocation5 + $0x390] sm:$0xff] }
  0x9f   :  { %780 = vmatpush.msra.mxu1 %v296_v35  ;;  %800 = vmatpush.msra.mxu2 %v360_v36  ;;  %v200_v5 = vld [vmem:[#allocation5 + $0x208] sm:$0xff]  ;;  %v177_v35 = vld [vmem:[#allocation5 + $0x150] sm:$0xff] }
  0xa0   :  { %819 = vmatpush.msra.mxu3 %v428_v37  ;;  %761 = vmatpush.msra.mxu0 %v228_v38  ;;  %v264_v6 = vld [vmem:[#allocation5 + $0x408] sm:$0xff]  ;;  %v245_v36 = vld [vmem:[#allocation5 + $0x370] sm:$0xff] }
  0xa1   :  { %781 = vmatpush.msra.mxu1 %v292_v39  ;;  %801 = vmatpush.msra.mxu2 %v356_v40  ;;  %v328_v8 = vld [vmem:[#allocation5 + $0x608] sm:$0xff]  ;;  %v173_v39 = vld [vmem:[#allocation5 + $0x130] sm:$0xff] }
  0xa2   :  { %820 = vmatpush.msra.mxu3 %v424_v41  ;;  %762 = vmatpush.msra.mxu0 %v224_v42  ;;  %v396_v9 = vld [vmem:[#allocation5 + $0x828] sm:$0xff]  ;;  %v241_v40 = vld [vmem:[#allocation5 + $0x350] sm:$0xff] }
  0xa3   :  { %782 = vmatpush.msra.mxu1 %v288_v43  ;;  %802 = vmatpush.msra.mxu2 %v352_v44  ;;  %v516_v10 = vld [vmem:[#allocation5 + $0xbe8] sm:$0xff]  ;;  %v169_v43 = vld [vmem:[#allocation5 + $0x110] sm:$0xff] }
  0xa4   :  { %821 = vmatpush.msra.mxu3 %v420_v45  ;;  %763 = vmatpush.msra.mxu0 %v220_v46  ;;  %v580_v11 = vld [vmem:[#allocation5 + $0xde8] sm:$0xff]  ;;  %v237_v44 = vld [vmem:[#allocation5 + $0x330] sm:$0xff] }
  0xa5   :  { %783 = vmatpush.msra.mxu1 %v284_v47  ;;  %803 = vmatpush.msra.mxu2 %v348_v48  ;;  %v392_v13 = vld [vmem:[#allocation5 + $0x808] sm:$0xff]  ;;  %v165_v47 = vld [vmem:[#allocation5 + $0xf0] sm:$0xff] }
  0xa6   :  { %822 = vmatpush.msra.mxu3 %v416_v49  ;;  %764 = vmatpush.msra.mxu0 %v216_v50  ;;  %v512_v14 = vld [vmem:[#allocation5 + $0xbc8] sm:$0xff]  ;;  %v233_v48 = vld [vmem:[#allocation5 + $0x310] sm:$0xff] }
  0xa7   :  { %784 = vmatpush.msra.mxu1 %v280_v51  ;;  %804 = vmatpush.msra.mxu2 %v344_v52  ;;  %v576_v15 = vld [vmem:[#allocation5 + $0xdc8] sm:$0xff]  ;;  %v161_v51 = vld [vmem:[#allocation5 + $0xd0] sm:$0xff] }
  0xa8   :  { %823 = vmatpush.msra.mxu3 %v412_v53  ;;  %765 = vmatpush.msra.mxu0 %v212_v54  ;;  %v508_v18 = vld [vmem:[#allocation5 + $0xba8] sm:$0xff]  ;;  %v229_v52 = vld [vmem:[#allocation5 + $0x2f0] sm:$0xff] }
  0xa9   :  { %785 = vmatpush.msra.mxu1 %v276_v55  ;;  %805 = vmatpush.msra.mxu2 %v340_v56  ;;  %v572_v20 = vld [vmem:[#allocation5 + $0xda8] sm:$0xff]  ;;  %v157_v55 = vld [vmem:[#allocation5 + $0xb0] sm:$0xff] }
  0xaa   :  { %824 = vmatpush.msra.mxu3 %v408_v57  ;;  %766 = vmatpush.msra.mxu0 %v208_v58  ;;  %v504_v23 = vld [vmem:[#allocation5 + $0xb88] sm:$0xff]  ;;  %v225_v56 = vld [vmem:[#allocation5 + $0x2d0] sm:$0xff] }
  0xab   :  { %786 = vmatpush.msra.mxu1 %v272_v59  ;;  %806 = vmatpush.msra.mxu2 %v336_v60  ;;  %v568_v25 = vld [vmem:[#allocation5 + $0xd88] sm:$0xff]  ;;  %v153_v59 = vld [vmem:[#allocation5 + $0x90] sm:$0xff] }
  0xac   :  { %825 = vmatpush.msra.mxu3 %v404_v61  ;;  %767 = vmatpush.msra.mxu0 %v204_v62  ;;  %v500_v28 = vld [vmem:[#allocation5 + $0xb68] sm:$0xff]  ;;  %v221_v60 = vld [vmem:[#allocation5 + $0x2b0] sm:$0xff] }
  0xad   :  { %787 = vmatpush.msra.mxu1 %v268_v2  ;;  %807 = vmatpush.msra.mxu2 %v332_v3  ;;  %v564_v30 = vld [vmem:[#allocation5 + $0xd68] sm:$0xff]  ;;  %v149_v2 = vld [vmem:[#allocation5 + $0x70] sm:$0xff] }
  0xae   :  { %826 = vmatpush.msra.mxu3 %v400_v4  ;;  %768 = vmatpush.msra.mxu0 %v200_v5  ;;  %v496_v33 = vld [vmem:[#allocation5 + $0xb48] sm:$0xff]  ;;  %v217_v3 = vld [vmem:[#allocation5 + $0x290] sm:$0xff] }
  0xaf   :  { %788 = vmatpush.msra.mxu1 %v264_v6  ;;  %808 = vmatpush.msra.mxu2 %v328_v8  ;;  %v560_v34 = vld [vmem:[#allocation5 + $0xd48] sm:$0xff]  ;;  %v145_v6 = vld [vmem:[#allocation5 + $0x50] sm:$0xff] }
  0xb0   :  { %827 = vmatpush.msra.mxu3 %v396_v9  ;;  %833 = vmatpush.msrb.mxu0 %v516_v10  ;;  %v492_v37 = vld [vmem:[#allocation5 + $0xb28] sm:$0xff]  ;;  %v213_v8 = vld [vmem:[#allocation5 + $0x270] sm:$0xff] }
  0xb1   :  { %853 = vmatpush.msrb.mxu1 %v580_v11  ;;  %873 = vmatpush.msrb.mxu2 %v197_v12  ;;  %v556_v38 = vld [vmem:[#allocation5 + $0xd28] sm:$0xff]  ;;  %v141_v11 = vld [vmem:[#allocation5 + $0x30] sm:$0xff] }
  0xb2   :  { %828 = vmatpush.msra.mxu3 %v392_v13  ;;  %834 = vmatpush.msrb.mxu0 %v512_v14  ;;  %v488_v41 = vld [vmem:[#allocation5 + $0xb08] sm:$0xff]  ;;  %v209_v12 = vld [vmem:[#allocation5 + $0x250] sm:$0xff] }
  0xb3   :  { %749 = vmatmul.f32.vlgmr.msrb.gmra.mxu3 %v2211_v63  ;;  %854 = vmatpush.msrb.mxu1 %v576_v15  ;;  %v552_v42 = vld [vmem:[#allocation5 + $0xd08] sm:$0xff]  ;;  %v137_v15 = vld [vmem:[#allocation5 + $0x10] sm:$0xff] }
  0xb4   :  { %874 = vmatpush.msrb.mxu2 %v193_v16  ;;  %893 = vmatpush.msrb.mxu3 %v261_v17  ;;  %v484_v45 = vld [vmem:[#allocation5 + $0xae8] sm:$0xff]  ;;  %v205_v16 = vld [vmem:[#allocation5 + $0x230] sm:$0xff] }
  0xb5   :  { %835 = vmatpush.msrb.mxu0 %v508_v18  ;;  %855 = vmatpush.msrb.mxu1 %v572_v20  ;;  %v548_v46 = vld [vmem:[#allocation5 + $0xce8] sm:$0xff]  ;;  %v389_v17 = vld [vmem:[#allocation5 + $0x7f0] sm:$0xff] }
  0xb6   :  { %875 = vmatpush.msrb.mxu2 %v189_v21  ;;  %894 = vmatpush.msrb.mxu3 %v257_v22  ;;  %v480_v49 = vld [vmem:[#allocation5 + $0xac8] sm:$0xff]  ;;  %v325_v18 = vld [vmem:[#allocation5 + $0x5f0] sm:$0xff] }
  0xb7   :  { %836 = vmatpush.msrb.mxu0 %v504_v23  ;;  %856 = vmatpush.msrb.mxu1 %v568_v25  ;;  %v544_v50 = vld [vmem:[#allocation5 + $0xcc8] sm:$0xff]  ;;  %v453_v20 = vld [vmem:[#allocation5 + $0x9f0] sm:$0xff] }
  0xb8   :  { %876 = vmatpush.msrb.mxu2 %v185_v26  ;;  %895 = vmatpush.msrb.mxu3 %v253_v27  ;;  %v476_v53 = vld [vmem:[#allocation5 + $0xaa8] sm:$0xff]  ;;  %v201_v21 = vld [vmem:[#allocation5 + $0x210] sm:$0xff] }
  0xb9   :  { %809 = vmatmul.f32.vlgmr.msra.gmra.mxu2 %v2220_v7  ;;  %837 = vmatpush.msrb.mxu0 %v500_v28  ;;  %v540_v54 = vld [vmem:[#allocation5 + $0xca8] sm:$0xff]  ;;  %v321_v22 = vld [vmem:[#allocation5 + $0x5d0] sm:$0xff] }
  0xba   :  { %857 = vmatpush.msrb.mxu1 %v564_v30  ;;  %877 = vmatpush.msrb.mxu2 %v181_v31  ;;  %v472_v57 = vld [vmem:[#allocation5 + $0xa88] sm:$0xff]  ;;  %v385_v23 = vld [vmem:[#allocation5 + $0x7d0] sm:$0xff] }
  0xbb   :  { %896 = vmatpush.msrb.mxu3 %v249_v32  ;;  %769 = vmatmul.f32.vlgmr.msra.gmra.mxu0 %v2213_v0  ;;  %v536_v58 = vld [vmem:[#allocation5 + $0xc88] sm:$0xff]  ;;  %v449_v25 = vld [vmem:[#allocation5 + $0x9d0] sm:$0xff] }
  0xbc   :  { %829 = vmatmul.f32.vlgmr.msra.gmra.mxu3 %v2225_v24  ;;  %838 = vmatpush.msrb.mxu0 %v496_v33  ;;  %v468_v61 = vld [vmem:[#allocation5 + $0xa68] sm:$0xff]  ;;  %v517_v26 = vld [vmem:[#allocation5 + $0xbf0] sm:$0xff] }
  0xbd   :  { %858 = vmatpush.msrb.mxu1 %v560_v34  ;;  %878 = vmatpush.msrb.mxu2 %v177_v35  ;;  %v532_v62 = vld [vmem:[#allocation5 + $0xc68] sm:$0xff]  ;;  %v317_v27 = vld [vmem:[#allocation5 + $0x5b0] sm:$0xff] }
  0xbe   :  { %897 = vmatpush.msrb.mxu3 %v245_v36  ;;  %789 = vmatmul.f32.vlgmr.msra.gmra.mxu1 %v2215_v1  ;;  %v464_v4 = vld [vmem:[#allocation5 + $0xa48] sm:$0xff]  ;;  %v381_v28 = vld [vmem:[#allocation5 + $0x7b0] sm:$0xff] }
  0xbf   :  { %839 = vmatpush.msrb.mxu0 %v492_v37  ;;  %859 = vmatpush.msrb.mxu1 %v556_v38  ;;  %v528_v5 = vld [vmem:[#allocation5 + $0xc48] sm:$0xff]  ;;  %v445_v30 = vld [vmem:[#allocation5 + $0x9b0] sm:$0xff] }
  0xc0   :  { %879 = vmatpush.msrb.mxu2 %v173_v39  ;;  %898 = vmatpush.msrb.mxu3 %v241_v40  ;;  %v460_v9 = vld [vmem:[#allocation5 + $0xa28] sm:$0xff]  ;;  %v513_v31 = vld [vmem:[#allocation5 + $0xbd0] sm:$0xff] }
  0xc1   :  { %840 = vmatpush.msrb.mxu0 %v488_v41  ;;  %860 = vmatpush.msrb.mxu1 %v552_v42  ;;  %v524_v10 = vld [vmem:[#allocation5 + $0xc28] sm:$0xff]  ;;  %v313_v32 = vld [vmem:[#allocation5 + $0x590] sm:$0xff] }
  0xc2   :  { %880 = vmatpush.msrb.mxu2 %v169_v43  ;;  %899 = vmatpush.msrb.mxu3 %v237_v44  ;;  %v456_v13 = vld [vmem:[#allocation5 + $0xa08] sm:$0xff]  ;;  %v377_v33 = vld [vmem:[#allocation5 + $0x790] sm:$0xff] }
  0xc3   :  { %841 = vmatpush.msrb.mxu0 %v484_v45  ;;  %861 = vmatpush.msrb.mxu1 %v548_v46  ;;  %v520_v14 = vld [vmem:[#allocation5 + $0xc08] sm:$0xff]  ;;  %v441_v34 = vld [vmem:[#allocation5 + $0x990] sm:$0xff] }
  0xc4   :  { %881 = vmatpush.msrb.mxu2 %v165_v47  ;;  %900 = vmatpush.msrb.mxu3 %v233_v48  ;;  %v509_v35 = vld [vmem:[#allocation5 + $0xbb0] sm:$0xff] }
  0xc5   :  { %842 = vmatpush.msrb.mxu0 %v480_v49  ;;  %862 = vmatpush.msrb.mxu1 %v544_v50  ;;  %v309_v36 = vld [vmem:[#allocation5 + $0x570] sm:$0xff] }
  0xc6   :  { %882 = vmatpush.msrb.mxu2 %v161_v51  ;;  %901 = vmatpush.msrb.mxu3 %v229_v52  ;;  %v373_v37 = vld [vmem:[#allocation5 + $0x770] sm:$0xff] }
  0xc7   :  { %843 = vmatpush.msrb.mxu0 %v476_v53  ;;  %863 = vmatpush.msrb.mxu1 %v540_v54  ;;  %v437_v38 = vld [vmem:[#allocation5 + $0x970] sm:$0xff] }
  0xc8   :  { %883 = vmatpush.msrb.mxu2 %v157_v55  ;;  %902 = vmatpush.msrb.mxu3 %v225_v56  ;;  %v505_v39 = vld [vmem:[#allocation5 + $0xb90] sm:$0xff] }
  0xc9   :  { %844 = vmatpush.msrb.mxu0 %v472_v57  ;;  %864 = vmatpush.msrb.mxu1 %v536_v58  ;;  %v305_v40 = vld [vmem:[#allocation5 + $0x550] sm:$0xff] }
  0xca   :  { %884 = vmatpush.msrb.mxu2 %v153_v59  ;;  %903 = vmatpush.msrb.mxu3 %v221_v60  ;;  %v369_v41 = vld [vmem:[#allocation5 + $0x750] sm:$0xff] }
  0xcb   :  { %845 = vmatpush.msrb.mxu0 %v468_v61  ;;  %865 = vmatpush.msrb.mxu1 %v532_v62  ;;  %v433_v42 = vld [vmem:[#allocation5 + $0x950] sm:$0xff] }
  0xcc   :  { %885 = vmatpush.msrb.mxu2 %v149_v2  ;;  %904 = vmatpush.msrb.mxu3 %v217_v3  ;;  %v501_v43 = vld [vmem:[#allocation5 + $0xb70] sm:$0xff] }
  0xcd   :  { %846 = vmatpush.msrb.mxu0 %v464_v4  ;;  %866 = vmatpush.msrb.mxu1 %v528_v5  ;;  %v301_v44 = vld [vmem:[#allocation5 + $0x530] sm:$0xff] }
  0xce   :  { %886 = vmatpush.msrb.mxu2 %v145_v6  ;;  %905 = vmatpush.msrb.mxu3 %v213_v8  ;;  %v365_v45 = vld [vmem:[#allocation5 + $0x730] sm:$0xff] }
  0xcf   :  { %847 = vmatpush.msrb.mxu0 %v460_v9  ;;  %867 = vmatpush.msrb.mxu1 %v524_v10  ;;  %v429_v46 = vld [vmem:[#allocation5 + $0x930] sm:$0xff] }
  0xd0   :  { %887 = vmatpush.msrb.mxu2 %v141_v11  ;;  %906 = vmatpush.msrb.mxu3 %v209_v12  ;;  %v497_v47 = vld [vmem:[#allocation5 + $0xb50] sm:$0xff] }
  0xd1   :  { %848 = vmatpush.msrb.mxu0 %v456_v13  ;;  %868 = vmatpush.msrb.mxu1 %v520_v14  ;;  %v297_v48 = vld [vmem:[#allocation5 + $0x510] sm:$0xff] }
  0xd2   :  { %888 = vmatpush.msrb.mxu2 %v137_v15  ;;  %907 = vmatpush.msrb.mxu3 %v205_v16  ;;  %v361_v49 = vld [vmem:[#allocation5 + $0x710] sm:$0xff] }
  0xd3   :  { %849 = vmatmul.f32.vlgmr.msrb.gmra.mxu0 %v2229_v29  ;;  %933 = vmatpush.msra.mxu1 %v389_v17  ;;  %v425_v50 = vld [vmem:[#allocation5 + $0x910] sm:$0xff] }
  0xd4   :  { %913 = vmatpush.msra.mxu0 %v325_v18  ;;  %953 = vmatpush.msra.mxu2 %v453_v20  ;;  %v493_v51 = vld [vmem:[#allocation5 + $0xb30] sm:$0xff] }
  0xd5   :  { %908 = vmatpush.msrb.mxu3 %v201_v21  ;;  %869 = vmatmul.f32.vlgmr.msrb.gmra.mxu1 %v2223_v19  ;;  %v293_v52 = vld [vmem:[#allocation5 + $0x4f0] sm:$0xff] }
  0xd6   :  { %914 = vmatpush.msra.mxu0 %v321_v22  ;;  %934 = vmatpush.msra.mxu1 %v385_v23  ;;  %v357_v53 = vld [vmem:[#allocation5 + $0x6f0] sm:$0xff] }
  0xd7   :  { %954 = vmatpush.msra.mxu2 %v449_v25  ;;  %973 = vmatpush.msra.mxu3 %v517_v26  ;;  %v421_v54 = vld [vmem:[#allocation5 + $0x8f0] sm:$0xff] }
  0xd8   :  { %915 = vmatpush.msra.mxu0 %v317_v27  ;;  %935 = vmatpush.msra.mxu1 %v381_v28  ;;  %v489_v55 = vld [vmem:[#allocation5 + $0xb10] sm:$0xff]  ;;  %v198_v27 = vld [vmem:[#allocation5 + $0x1f8] sm:$0xff] }
  0xd9   :  { %955 = vmatpush.msra.mxu2 %v445_v30  ;;  %974 = vmatpush.msra.mxu3 %v513_v31  ;;  %v289_v56 = vld [vmem:[#allocation5 + $0x4d0] sm:$0xff]  ;;  %v262_v28 = vld [vmem:[#allocation5 + $0x3f8] sm:$0xff] }
  0xda   :  { %916 = vmatpush.msra.mxu0 %v313_v32  ;;  %936 = vmatpush.msra.mxu1 %v377_v33  ;;  %v353_v57 = vld [vmem:[#allocation5 + $0x6d0] sm:$0xff]  ;;  %v194_v32 = vld [vmem:[#allocation5 + $0x1d8] sm:$0xff] }
  0xdb   :  { %956 = vmatpush.msra.mxu2 %v441_v34  ;;  %975 = vmatpush.msra.mxu3 %v509_v35  ;;  %v417_v58 = vld [vmem:[#allocation5 + $0x8d0] sm:$0xff]  ;;  %v258_v33 = vld [vmem:[#allocation5 + $0x3d8] sm:$0xff] }
  0xdc   :  { %917 = vmatpush.msra.mxu0 %v309_v36  ;;  %937 = vmatpush.msra.mxu1 %v373_v37  ;;  %v485_v59 = vld [vmem:[#allocation5 + $0xaf0] sm:$0xff]  ;;  %v326_v34 = vld [vmem:[#allocation5 + $0x5f8] sm:$0xff] }
  0xdd   :  { %957 = vmatpush.msra.mxu2 %v437_v38  ;;  %976 = vmatpush.msra.mxu3 %v505_v39  ;;  %v285_v60 = vld [vmem:[#allocation5 + $0x4b0] sm:$0xff]  ;;  %v190_v36 = vld [vmem:[#allocation5 + $0x1b8] sm:$0xff] }
  0xde   :  { %918 = vmatpush.msra.mxu0 %v305_v40  ;;  %938 = vmatpush.msra.mxu1 %v369_v41  ;;  %v349_v61 = vld [vmem:[#allocation5 + $0x6b0] sm:$0xff]  ;;  %v254_v37 = vld [vmem:[#allocation5 + $0x3b8] sm:$0xff] }
  0xdf   :  { %958 = vmatpush.msra.mxu2 %v433_v42  ;;  %977 = vmatpush.msra.mxu3 %v501_v43  ;;  %v413_v62 = vld [vmem:[#allocation5 + $0x8b0] sm:$0xff]  ;;  %v322_v38 = vld [vmem:[#allocation5 + $0x5d8] sm:$0xff] }
  0xe0   :  { %919 = vmatpush.msra.mxu0 %v301_v44  ;;  %939 = vmatpush.msra.mxu1 %v365_v45  ;;  %v481_v2 = vld [vmem:[#allocation5 + $0xad0] sm:$0xff]  ;;  %v186_v40 = vld [vmem:[#allocation5 + $0x198] sm:$0xff] }
  0xe1   :  { %959 = vmatpush.msra.mxu2 %v429_v46  ;;  %978 = vmatpush.msra.mxu3 %v497_v47  ;;  %v281_v3 = vld [vmem:[#allocation5 + $0x490] sm:$0xff]  ;;  %v318_v41 = vld [vmem:[#allocation5 + $0x5b8] sm:$0xff] }
  0xe2   :  { %920 = vmatpush.msra.mxu0 %v297_v48  ;;  %940 = vmatpush.msra.mxu1 %v361_v49  ;;  %v345_v4 = vld [vmem:[#allocation5 + $0x690] sm:$0xff]  ;;  %v182_v43 = vld [vmem:[#allocation5 + $0x178] sm:$0xff] }
  0xe3   :  { %960 = vmatpush.msra.mxu2 %v425_v50  ;;  %979 = vmatpush.msra.mxu3 %v493_v51  ;;  %v409_v5 = vld [vmem:[#allocation5 + $0x890] sm:$0xff]  ;;  %v246_v44 = vld [vmem:[#allocation5 + $0x378] sm:$0xff] }
  0xe4   :  { %921 = vmatpush.msra.mxu0 %v293_v52  ;;  %941 = vmatpush.msra.mxu1 %v357_v53  ;;  %v477_v6 = vld [vmem:[#allocation5 + $0xab0] sm:$0xff]  ;;  %v178_v46 = vld [vmem:[#allocation5 + $0x158] sm:$0xff] }
  0xe5   :  { %961 = vmatpush.msra.mxu2 %v421_v54  ;;  %980 = vmatpush.msra.mxu3 %v489_v55  ;;  %v277_v8 = vld [vmem:[#allocation5 + $0x470] sm:$0xff]  ;;  %v242_v47 = vld [vmem:[#allocation5 + $0x358] sm:$0xff] }
  0xe6   :  { %922 = vmatpush.msra.mxu0 %v289_v56  ;;  %942 = vmatpush.msra.mxu1 %v353_v57  ;;  %v341_v9 = vld [vmem:[#allocation5 + $0x670] sm:$0xff]  ;;  %v310_v48 = vld [vmem:[#allocation5 + $0x578] sm:$0xff] }
  0xe7   :  { %962 = vmatpush.msra.mxu2 %v417_v58  ;;  %981 = vmatpush.msra.mxu3 %v485_v59  ;;  %v405_v10 = vld [vmem:[#allocation5 + $0x870] sm:$0xff]  ;;  %v174_v50 = vld [vmem:[#allocation5 + $0x138] sm:$0xff] }
  0xe8   :  { %923 = vmatpush.msra.mxu0 %v285_v60  ;;  %943 = vmatpush.msra.mxu1 %v349_v61  ;;  %v473_v11 = vld [vmem:[#allocation5 + $0xa90] sm:$0xff]  ;;  %v238_v51 = vld [vmem:[#allocation5 + $0x338] sm:$0xff] }
  0xe9   :  { %963 = vmatpush.msra.mxu2 %v413_v62  ;;  %982 = vmatpush.msra.mxu3 %v481_v2  ;;  %v273_v12 = vld [vmem:[#allocation5 + $0x450] sm:$0xff]  ;;  %v306_v52 = vld [vmem:[#allocation5 + $0x558] sm:$0xff] }
  0xea   :  { %924 = vmatpush.msra.mxu0 %v281_v3  ;;  %944 = vmatpush.msra.mxu1 %v345_v4  ;;  %v337_v13 = vld [vmem:[#allocation5 + $0x650] sm:$0xff]  ;;  %v170_v53 = vld [vmem:[#allocation5 + $0x118] sm:$0xff] }
  0xeb   :  { %964 = vmatpush.msra.mxu2 %v409_v5  ;;  %983 = vmatpush.msra.mxu3 %v477_v6  ;;  %v401_v14 = vld [vmem:[#allocation5 + $0x850] sm:$0xff]  ;;  %v234_v54 = vld [vmem:[#allocation5 + $0x318] sm:$0xff] }
  0xec   :  { %925 = vmatpush.msra.mxu0 %v277_v8  ;;  %945 = vmatpush.msra.mxu1 %v341_v9  ;;  %v469_v15 = vld [vmem:[#allocation5 + $0xa70] sm:$0xff]  ;;  %v302_v55 = vld [vmem:[#allocation5 + $0x538] sm:$0xff] }
  0xed   :  { %965 = vmatpush.msra.mxu2 %v405_v10  ;;  %984 = vmatpush.msra.mxu3 %v473_v11  ;;  %v269_v16 = vld [vmem:[#allocation5 + $0x430] sm:$0xff]  ;;  %v230_v56 = vld [vmem:[#allocation5 + $0x2f8] sm:$0xff] }
  0xee   :  { %v333_v17 = vld [vmem:[#allocation5 + $0x630] sm:$0xff]  ;;  %926 = vmatpush.msra.mxu0 %v273_v12  ;;  %946 = vmatpush.msra.mxu1 %v337_v13  ;;  %v298_v57 = vld [vmem:[#allocation5 + $0x518] sm:$0xff] }
  0xef   :  { %v397_v18 = vld [vmem:[#allocation5 + $0x830] sm:$0xff]  ;;  %966 = vmatpush.msra.mxu2 %v401_v14  ;;  %985 = vmatpush.msra.mxu3 %v469_v15  ;;  %v162_v59 = vld [vmem:[#allocation5 + $0xd8] sm:$0xff] }
  0xf0   :  { %v465_v20 = vld [vmem:[#allocation5 + $0xa50] sm:$0xff]  ;;  %927 = vmatpush.msra.mxu0 %v269_v16  ;;  %947 = vmatpush.msra.mxu1 %v333_v17  ;;  %v294_v60 = vld [vmem:[#allocation5 + $0x4f8] sm:$0xff] }
  0xf1   :  { %v265_v21 = vld [vmem:[#allocation5 + $0x410] sm:$0xff]  ;;  %967 = vmatpush.msra.mxu2 %v397_v18  ;;  %986 = vmatpush.msra.mxu3 %v465_v20  ;;  %v158_v62 = vld [vmem:[#allocation5 + $0xb8] sm:$0xff] }
  0xf2   :  { %v329_v22 = vld [vmem:[#allocation5 + $0x610] sm:$0xff]  ;;  %928 = vmatpush.msra.mxu0 %v265_v21  ;;  %889 = vmatmul.f32.vlgmr.msrb.gmra.mxu2 %v2211_v63  ;;  %v250_v63 = vld [vmem:[#allocation5 + $0x398] sm:$0xff] }
  0xf3   :  { %v393_v23 = vld [vmem:[#allocation5 + $0x810] sm:$0xff]  ;;  %948 = vmatpush.msra.mxu1 %v329_v22  ;;  %909 = vmatmul.f32.vlgmr.msrb.gmra.mxu3 %v2213_v0  ;;  %v314_v0 = vld [vmem:[#allocation5 + $0x598] sm:$0xff] }
  0xf4   :  { %v461_v25 = vld [vmem:[#allocation5 + $0xa30] sm:$0xff]  ;;  %968 = vmatpush.msra.mxu2 %v393_v23  ;;  %929 = vmatmul.f32.vlgmr.msra.gmra.mxu0 %v2215_v1  ;;  %v222_v2 = vld [vmem:[#allocation5 + $0x2b8] sm:$0xff] }
  0xf5   :  { %v581_v26 = vld [vmem:[#allocation5 + $0xdf0] sm:$0xff]  ;;  %987 = vmatpush.msra.mxu3 %v461_v25  ;;  %1013 = vmatpush.msrb.mxu1 %v198_v27  ;;  %v290_v3 = vld [vmem:[#allocation5 + $0x4d8] sm:$0xff] }
  0xf6   :  { %v457_v30 = vld [vmem:[#allocation5 + $0xa10] sm:$0xff]  ;;  %993 = vmatpush.msrb.mxu0 %v581_v26  ;;  %1033 = vmatpush.msrb.mxu2 %v262_v28  ;;  %v154_v5 = vld [vmem:[#allocation5 + $0x98] sm:$0xff] }
  0xf7   :  { %v577_v31 = vld [vmem:[#allocation5 + $0xdd0] sm:$0xff]  ;;  %988 = vmatpush.msra.mxu3 %v457_v30  ;;  %1014 = vmatpush.msrb.mxu1 %v194_v32  ;;  %v218_v6 = vld [vmem:[#allocation5 + $0x298] sm:$0xff] }
  0xf8   :  { %994 = vmatpush.msrb.mxu0 %v577_v31  ;;  %v573_v35 = vld [vmem:[#allocation5 + $0xdb0] sm:$0xff]  ;;  %1034 = vmatpush.msrb.mxu2 %v258_v33  ;;  %v286_v8 = vld [vmem:[#allocation5 + $0x4b8] sm:$0xff] }
  0xf9   :  { %1053 = vmatpush.msrb.mxu3 %v326_v34  ;;  %v569_v39 = vld [vmem:[#allocation5 + $0xd90] sm:$0xff]  ;;  %1015 = vmatpush.msrb.mxu1 %v190_v36  ;;  %v150_v10 = vld [vmem:[#allocation5 + $0x78] sm:$0xff] }
  0xfa   :  { %995 = vmatpush.msrb.mxu0 %v573_v35  ;;  %1035 = vmatpush.msrb.mxu2 %v254_v37  ;;  %v565_v42 = vld [vmem:[#allocation5 + $0xd70] sm:$0xff]  ;;  %v214_v11 = vld [vmem:[#allocation5 + $0x278] sm:$0xff] }
  0xfb   :  { %1054 = vmatpush.msrb.mxu3 %v322_v38  ;;  %1016 = vmatpush.msrb.mxu1 %v186_v40  ;;  %v561_v45 = vld [vmem:[#allocation5 + $0xd50] sm:$0xff]  ;;  %v282_v12 = vld [vmem:[#allocation5 + $0x498] sm:$0xff] }
  0xfc   :  { %996 = vmatpush.msrb.mxu0 %v569_v39  ;;  %1036 = vmatpush.msrb.mxu2 %v250_v63  ;;  %v557_v49 = vld [vmem:[#allocation5 + $0xd30] sm:$0xff]  ;;  %v146_v14 = vld [vmem:[#allocation5 + $0x58] sm:$0xff] }
  0xfd   :  { %1055 = vmatpush.msrb.mxu3 %v318_v41  ;;  %969 = vmatmul.f32.vlgmr.msra.gmra.mxu2 %v2225_v24  ;;  %v553_v24 = vld [vmem:[#allocation5 + $0xd10] sm:$0xff]  ;;  %v210_v15 = vld [vmem:[#allocation5 + $0x258] sm:$0xff] }
  0xfe   :  { %997 = vmatpush.msrb.mxu0 %v565_v42  ;;  %1017 = vmatpush.msrb.mxu1 %v182_v43  ;;  %v549_v1 = vld [vmem:[#allocation5 + $0xcf0] sm:$0xff]  ;;  %v278_v16 = vld [vmem:[#allocation5 + $0x478] sm:$0xff] }
  0xff   :  { %1037 = vmatpush.msrb.mxu2 %v246_v44  ;;  %1056 = vmatpush.msrb.mxu3 %v314_v0  ;;  %v545_v58 = vld [vmem:[#allocation5 + $0xcd0] sm:$0xff]  ;;  %v142_v18 = vld [vmem:[#allocation5 + $0x38] sm:$0xff] }
 0x100   :  { %989 = vmatmul.f32.vlgmr.msra.gmra.mxu3 %v2229_v29  ;;  %998 = vmatpush.msrb.mxu0 %v561_v45  ;;  %v166_v29 = vld [vmem:[#allocation5 + $0xf8] sm:$0xff]  ;;  %v541_v61 = vld [vmem:[#allocation5 + $0xcb0] sm:$0xff] }
 0x101   :  { %1018 = vmatpush.msrb.mxu1 %v178_v46  ;;  %1038 = vmatpush.msrb.mxu2 %v242_v47  ;;  %v537_v4 = vld [vmem:[#allocation5 + $0xc90] sm:$0xff]  ;;  %v206_v20 = vld [vmem:[#allocation5 + $0x238] sm:$0xff] }
 0x102   :  { %1057 = vmatpush.msrb.mxu3 %v310_v48  ;;  %949 = vmatmul.f32.vlgmr.msra.gmra.mxu1 %v2220_v7  ;;  %v226_v7 = vld [vmem:[#allocation5 + $0x2d8] sm:$0xff]  ;;  %v533_v9 = vld [vmem:[#allocation5 + $0xc70] sm:$0xff] }
 0x103   :  { %999 = vmatpush.msrb.mxu0 %v557_v49  ;;  %1019 = vmatpush.msrb.mxu1 %v174_v50  ;;  %v529_v13 = vld [vmem:[#allocation5 + $0xc50] sm:$0xff]  ;;  %v274_v21 = vld [vmem:[#allocation5 + $0x458] sm:$0xff] }
 0x104   :  { %1039 = vmatpush.msrb.mxu2 %v238_v51  ;;  %1058 = vmatpush.msrb.mxu3 %v306_v52  ;;  %v525_v17 = vld [vmem:[#allocation5 + $0xc30] sm:$0xff]  ;;  %v138_v23 = vld [vmem:[#allocation5 + $0x18] sm:$0xff] }
 0x105   :  { %1000 = vmatpush.msrb.mxu0 %v553_v24  ;;  %1020 = vmatpush.msrb.mxu1 %v170_v53  ;;  %v521_v22 = vld [vmem:[#allocation5 + $0xc10] sm:$0xff]  ;;  %v202_v25 = vld [vmem:[#allocation5 + $0x218] sm:$0xff] }
 0x106   :  { %1040 = vmatpush.msrb.mxu2 %v234_v54  ;;  %1059 = vmatpush.msrb.mxu3 %v302_v55  ;;  %v270_v26 = vld [vmem:[#allocation5 + $0x438] sm:$0xff] }
 0x107   :  { %1001 = vmatpush.msrb.mxu0 %v549_v1  ;;  %1021 = vmatpush.msrb.mxu1 %v166_v29  ;;  %v454_v27 = vld [vmem:[#allocation5 + $0x9f8] sm:$0xff] }
 0x108   :  { %1041 = vmatpush.msrb.mxu2 %v230_v56  ;;  %1060 = vmatpush.msrb.mxu3 %v298_v57  ;;  %v390_v28 = vld [vmem:[#allocation5 + $0x7f8] sm:$0xff] }
 0x109   :  { %1002 = vmatpush.msrb.mxu0 %v545_v58  ;;  %1022 = vmatpush.msrb.mxu1 %v162_v59  ;;  %v518_v30 = vld [vmem:[#allocation5 + $0xbf8] sm:$0xff] }
 0x10a   :  { %1042 = vmatpush.msrb.mxu2 %v226_v7  ;;  %1061 = vmatpush.msrb.mxu3 %v294_v60  ;;  %v266_v31 = vld [vmem:[#allocation5 + $0x418] sm:$0xff] }
 0x10b   :  { %1003 = vmatpush.msrb.mxu0 %v541_v61  ;;  %1023 = vmatpush.msrb.mxu1 %v158_v62  ;;  %v450_v32 = vld [vmem:[#allocation5 + $0x9d8] sm:$0xff] }
 0x10c   :  { %1043 = vmatpush.msrb.mxu2 %v222_v2  ;;  %1062 = vmatpush.msrb.mxu3 %v290_v3  ;;  %v386_v33 = vld [vmem:[#allocation5 + $0x7d8] sm:$0xff] }
 0x10d   :  { %1004 = vmatpush.msrb.mxu0 %v537_v4  ;;  %1024 = vmatpush.msrb.mxu1 %v154_v5  ;;  %v514_v34 = vld [vmem:[#allocation5 + $0xbd8] sm:$0xff] }
 0x10e   :  { %1044 = vmatpush.msrb.mxu2 %v218_v6  ;;  %1063 = vmatpush.msrb.mxu3 %v286_v8  ;;  %v582_v35 = vld [vmem:[#allocation5 + $0xdf8] sm:$0xff] }
 0x10f   :  { %1005 = vmatpush.msrb.mxu0 %v533_v9  ;;  %1025 = vmatpush.msrb.mxu1 %v150_v10  ;;  %v446_v36 = vld [vmem:[#allocation5 + $0x9b8] sm:$0xff] }
 0x110   :  { %1045 = vmatpush.msrb.mxu2 %v214_v11  ;;  %1064 = vmatpush.msrb.mxu3 %v282_v12  ;;  %v382_v37 = vld [vmem:[#allocation5 + $0x7b8] sm:$0xff]  ;;  %v610_v11 = vpop.f32.mrf.mxu0 }
 0x111   :  { %1006 = vmatpush.msrb.mxu0 %v529_v13  ;;  %1026 = vmatpush.msrb.mxu1 %v146_v14  ;;  %v510_v38 = vld [vmem:[#allocation5 + $0xbb8] sm:$0xff]  ;;  %v1929_v14 = vld [vmem:[#allocation2 + $0x8] sm:$0xff] }
 0x112   :  { %1046 = vmatpush.msrb.mxu2 %v210_v15  ;;  %1065 = vmatpush.msrb.mxu3 %v278_v16  ;;  %v578_v39 = vld [vmem:[#allocation5 + $0xdd8] sm:$0xff] }
 0x113   :  { %1007 = vmatpush.msrb.mxu0 %v525_v17  ;;  %1027 = vmatpush.msrb.mxu1 %v142_v18  ;;  %v442_v40 = vld [vmem:[#allocation5 + $0x998] sm:$0xff] }
 0x114   :  { %1047 = vmatpush.msrb.mxu2 %v206_v20  ;;  %1066 = vmatpush.msrb.mxu3 %v274_v21  ;;  %v378_v63 = vld [vmem:[#allocation5 + $0x798] sm:$0xff]  ;;  %v630_v20 = vpop.f32.mrf.mxu1 }
 0x115   :  { %1008 = vmatpush.msrb.mxu0 %v521_v22  ;;  %1028 = vmatpush.msrb.mxu1 %v138_v23  ;;  %v506_v41 = vld [vmem:[#allocation5 + $0xb98] sm:$0xff] }
 0x116   :  { %1048 = vmatpush.msrb.mxu2 %v202_v25  ;;  %1067 = vmatpush.msrb.mxu3 %v270_v26  ;;  %v438_v42 = vld [vmem:[#allocation5 + $0x978] sm:$0xff] }
 0x117   :  { %1009 = vmatmul.f32.vlgmr.msrb.gmra.mxu0 %v2223_v19  ;;  %1093 = vmatpush.msra.mxu1 %v454_v27  ;;  %v574_v19 = vld [vmem:[#allocation5 + $0xdb8] sm:$0xff]  ;;  %v2246_v27 = vld [vmem:[#allocation7] sm:$0xf] }
 0x118   :  { %1073 = vmatpush.msra.mxu0 %v390_v28  ;;  %1113 = vmatpush.msra.mxu2 %v518_v30  ;;  %v374_v43 = vld [vmem:[#allocation5 + $0x778] sm:$0xff]  ;;  %v2248_v28 = vpop.f32.mrf.mxu3  ;;  %v1931_v30 = vld [vmem:[#allocation2] sm:$0xff] }
 0x119   :  { %1068 = vmatpush.msrb.mxu3 %v266_v31  ;;  %1094 = vmatpush.msra.mxu1 %v450_v32  ;;  %v502_v44 = vld [vmem:[#allocation5 + $0xb78] sm:$0xff] }
 0x11a   :  { %1074 = vmatpush.msra.mxu0 %v386_v33  ;;  %1114 = vmatpush.msra.mxu2 %v514_v34  ;;  %v570_v0 = vld [vmem:[#allocation5 + $0xd98] sm:$0xff] }
 0x11b   :  { %1133 = vmatpush.msra.mxu3 %v582_v35  ;;  %1095 = vmatpush.msra.mxu1 %v446_v36  ;;  %v434_v45 = vld [vmem:[#allocation5 + $0x958] sm:$0xff]  ;;  %v650_v35 = vpop.f32.mrf.mxu2  ;;  %v1217_v36 = vld [vmem:[#allocation8 + $0x1e0] sm:$0xff] }
 0x11c   :  { %1075 = vmatpush.msra.mxu0 %v382_v37  ;;  %1115 = vmatpush.msra.mxu2 %v510_v38  ;;  %v370_v46 = vld [vmem:[#allocation5 + $0x758] sm:$0xff]  ;;  %v585_v37 = vperm.slane %v2246_v27, 0  ;;  %v1281_v38 = vld [vmem:[#allocation8 + $0x3e0] sm:$0xff] }
 0x11d   :  { %1134 = vmatpush.msra.mxu3 %v578_v39  ;;  %1096 = vmatpush.msra.mxu1 %v442_v40  ;;  %v498_v47 = vld [vmem:[#allocation5 + $0xb58] sm:$0xff]  ;;  %v2251_v40 = vpop.f32.mrf.mxu0 }
 0x11e   :  { %1076 = vmatpush.msra.mxu0 %v378_v63  ;;  %1116 = vmatpush.msra.mxu2 %v506_v41  ;;  %v566_v48 = vld [vmem:[#allocation5 + $0xd78] sm:$0xff]  ;;  %v1932_v63 = vld [vmem:[#allocation2 + $0x28] sm:$0xff]  ;;  %v1213_v41 = vld [vmem:[#allocation8 + $0x1c0] sm:$0xff] }
 0x11f   :  { %1135 = vmatpush.msra.mxu3 %v574_v19  ;;  %1097 = vmatpush.msra.mxu1 %v438_v42  ;;  %v430_v49 = vld [vmem:[#allocation5 + $0x938] sm:$0xff]  ;;  %v1277_v19 = vld [vmem:[#allocation8 + $0x3c0] sm:$0xff]  ;;  %v611_v42 = vadd.f32 %v610_v11, %v585_v37 }
 0x120   :  { %1077 = vmatpush.msra.mxu0 %v374_v43  ;;  %1117 = vmatpush.msra.mxu2 %v502_v44  ;;  %v366_v50 = vld [vmem:[#allocation5 + $0x738] sm:$0xff]  ;;  %v1933_v43 = vld [vmem:[#allocation2 + $0x18] sm:$0xff] }
 0x121   :  { %1136 = vmatpush.msra.mxu3 %v570_v0  ;;  %1098 = vmatpush.msra.mxu1 %v434_v45  ;;  %v494_v51 = vld [vmem:[#allocation5 + $0xb38] sm:$0xff]  ;;  %v1209_v0 = vld [vmem:[#allocation8 + $0x1a0] sm:$0xff] }
 0x122   :  { %1078 = vmatpush.msra.mxu0 %v370_v46  ;;  %1118 = vmatpush.msra.mxu2 %v498_v47  ;;  %v562_v52 = vld [vmem:[#allocation5 + $0xd58] sm:$0xff]  ;;  %v1273_v45 = vld [vmem:[#allocation8 + $0x3a0] sm:$0xff]  ;;  %v586_v46 = vperm.slane %v2246_v27, 1  ;;  %v2254_v47 = vpop.f32.mrf.mxu1 }
 0x123   :  { %v426_v24 = vld [vmem:[#allocation5 + $0x918] sm:$0xff]  ;;  %1137 = vmatpush.msra.mxu3 %v566_v48  ;;  %1099 = vmatpush.msra.mxu1 %v430_v49  ;;  %v1935_v49 = vld [vmem:[#allocation2 + $0x20] sm:$0xff] }
 0x124   :  { %v362_v53 = vld [vmem:[#allocation5 + $0x718] sm:$0xff]  ;;  %1079 = vmatpush.msra.mxu0 %v366_v50  ;;  %1119 = vmatpush.msra.mxu2 %v494_v51  ;;  %v1205_v50 = vld [vmem:[#allocation8 + $0x180] sm:$0xff] }
 0x125   :  { %v490_v54 = vld [vmem:[#allocation5 + $0xb18] sm:$0xff]  ;;  %1138 = vmatpush.msra.mxu3 %v562_v52  ;;  %1100 = vmatpush.msra.mxu1 %v426_v24  ;;  %v1269_v51 = vld [vmem:[#allocation8 + $0x380] sm:$0xff]  ;;  %v631_v24 = vadd.f32 %v630_v20, %v611_v42 }
 0x126   :  { %v558_v55 = vld [vmem:[#allocation5 + $0xd38] sm:$0xff]  ;;  %1080 = vmatpush.msra.mxu0 %v362_v53  ;;  %1120 = vmatpush.msra.mxu2 %v490_v54  ;;  %v1345_v52 = vld [vmem:[#allocation8 + $0x5e0] sm:$0xff] }
 0x127   :  { %v422_v1 = vld [vmem:[#allocation5 + $0x8f8] sm:$0xff]  ;;  %1139 = vmatpush.msra.mxu3 %v558_v55  ;;  %1049 = vmatmul.f32.vlgmr.msrb.gmra.mxu2 %v1929_v14  ;;  %v1201_v53 = vld [vmem:[#allocation8 + $0x160] sm:$0xff] }
 0x128   :  { %v358_v29 = vld [vmem:[#allocation5 + $0x6f8] sm:$0xff]  ;;  %1101 = vmatpush.msra.mxu1 %v422_v1  ;;  %v1265_v54 = vld [vmem:[#allocation8 + $0x360] sm:$0xff]  ;;  %v2256_v1 = vpop.f32.mrf.mxu2 }
 0x129   :  { %v486_v56 = vld [vmem:[#allocation5 + $0xaf8] sm:$0xff]  ;;  %1081 = vmatpush.msra.mxu0 %v358_v29  ;;  %1029 = vmatmul.f32.vlgmr.msrb.gmra.mxu1 %v1931_v30  ;;  %v1249_v11 = vld [vmem:[#allocation8 + $0x2e0] sm:$0xff] }
 0x12a   :  { %v554_v57 = vld [vmem:[#allocation5 + $0xd18] sm:$0xff]  ;;  %1121 = vmatpush.msra.mxu2 %v486_v56  ;;  %v1341_v56 = vld [vmem:[#allocation8 + $0x5c0] sm:$0xff] }
 0x12b   :  { %v418_v58 = vld [vmem:[#allocation5 + $0x8d8] sm:$0xff]  ;;  %1140 = vmatpush.msra.mxu3 %v554_v57  ;;  %v1197_v57 = vld [vmem:[#allocation8 + $0x140] sm:$0xff] }
 0x12c   :  { %v354_v59 = vld [vmem:[#allocation5 + $0x6d8] sm:$0xff]  ;;  %1102 = vmatpush.msra.mxu1 %v418_v58  ;;  %v1261_v58 = vld [vmem:[#allocation8 + $0x340] sm:$0xff] }
 0x12d   :  { %v482_v7 = vld [vmem:[#allocation5 + $0xad8] sm:$0xff]  ;;  %1082 = vmatpush.msra.mxu0 %v354_v59  ;;  %v1337_v59 = vld [vmem:[#allocation8 + $0x5a0] sm:$0xff] }
 0x12e   :  { %v550_v60 = vld [vmem:[#allocation5 + $0xcf8] sm:$0xff]  ;;  %1122 = vmatpush.msra.mxu2 %v482_v7  ;;  %v651_v7 = vadd.f32 %v650_v35, %v631_v24  ;;  %v1181_v14 = vld [vmem:[#allocation8 + $0xc0] sm:$0xff] }
 0x12f   :  { %v414_v61 = vld [vmem:[#allocation5 + $0x8b8] sm:$0xff]  ;;  %1141 = vmatpush.msra.mxu3 %v550_v60  ;;  %v1177_v20 = vld [vmem:[#allocation8 + $0xa0] sm:$0xff] }
 0x130   :  { %v350_v62 = vld [vmem:[#allocation5 + $0x6b8] sm:$0xff]  ;;  %1103 = vmatpush.msra.mxu1 %v414_v61  ;;  %v1193_v61 = vld [vmem:[#allocation8 + $0x120] sm:$0xff] }
 0x131   :  { %v478_v2 = vld [vmem:[#allocation5 + $0xab8] sm:$0xff]  ;;  %1083 = vmatpush.msra.mxu0 %v350_v62  ;;  %v1257_v62 = vld [vmem:[#allocation8 + $0x320] sm:$0xff] }
 0x132   :  { %v546_v3 = vld [vmem:[#allocation5 + $0xcd8] sm:$0xff]  ;;  %1123 = vmatpush.msra.mxu2 %v478_v2  ;;  %v1309_v35 = vld [vmem:[#allocation8 + $0x4c0] sm:$0xff] }
 0x133   :  { %v410_v4 = vld [vmem:[#allocation5 + $0x898] sm:$0xff]  ;;  %1142 = vmatpush.msra.mxu3 %v546_v3  ;;  %v1333_v3 = vld [vmem:[#allocation8 + $0x580] sm:$0xff] }
 0x134   :  { %v346_v5 = vld [vmem:[#allocation5 + $0x698] sm:$0xff]  ;;  %1104 = vmatpush.msra.mxu1 %v410_v4  ;;  %v1189_v4 = vld [vmem:[#allocation8 + $0x100] sm:$0xff] }
 0x135   :  { %v474_v6 = vld [vmem:[#allocation5 + $0xa98] sm:$0xff]  ;;  %1084 = vmatpush.msra.mxu0 %v346_v5  ;;  %v1253_v5 = vld [vmem:[#allocation8 + $0x300] sm:$0xff] }
 0x136   :  { %v542_v8 = vld [vmem:[#allocation5 + $0xcb8] sm:$0xff]  ;;  %1124 = vmatpush.msra.mxu2 %v474_v6  ;;  %v750_v48 = vpop.f32.mrf.mxu3  ;;  %v1329_v6 = vld [vmem:[#allocation8 + $0x560] sm:$0xff] }
 0x137   :  { %v342_v9 = vld [vmem:[#allocation5 + $0x678] sm:$0xff]  ;;  %1143 = vmatpush.msra.mxu3 %v542_v8  ;;  %v751_v55 = vadd.f32 %v750_v48, %v586_v46  ;;  %v671_v8 = vadd.f32 %v2248_v28, %v651_v7  ;;  %v1313_v28 = vld [vmem:[#allocation8 + $0x4e0] sm:$0xff]  ;;  %v1342_v7 = vld [vmem:[#allocation8 + $0x5c8] sm:$0xff] }
 0x138   :  { %v406_v10 = vld [vmem:[#allocation5 + $0x878] sm:$0xff]  ;;  %1085 = vmatpush.msra.mxu0 %v342_v9  ;;  %v770_v29 = vpop.f32.mrf.mxu0  ;;  %v1229_v37 = vld [vmem:[#allocation8 + $0x240] sm:$0xff] }
 0x139   :  { %v470_v12 = vld [vmem:[#allocation5 + $0xa78] sm:$0xff]  ;;  %1105 = vmatpush.msra.mxu1 %v406_v10  ;;  %v771_v60 = vadd.f32 %v770_v29, %v751_v55  ;;  %v1185_v10 = vld [vmem:[#allocation8 + $0xe0] sm:$0xff]  ;;  %v1266_v29 = vld [vmem:[#allocation8 + $0x368] sm:$0xff] }
 0x13a   :  { %v538_v13 = vld [vmem:[#allocation5 + $0xc98] sm:$0xff]  ;;  %1125 = vmatpush.msra.mxu2 %v470_v12  ;;  %v1293_v24 = vld [vmem:[#allocation8 + $0x440] sm:$0xff] }
 0x13b   :  { %v338_v15 = vld [vmem:[#allocation5 + $0x658] sm:$0xff]  ;;  %1144 = vmatpush.msra.mxu3 %v538_v13  ;;  %v790_v2 = vpop.f32.mrf.mxu1  ;;  %v1325_v13 = vld [vmem:[#allocation8 + $0x540] sm:$0xff] }
 0x13c   :  { %v402_v16 = vld [vmem:[#allocation5 + $0x858] sm:$0xff]  ;;  %1086 = vmatpush.msra.mxu0 %v338_v15  ;;  %v791_v9 = vadd.f32 %v790_v2, %v771_v60  ;;  %v810_v12 = vpop.f32.mrf.mxu2  ;;  %v1245_v15 = vld [vmem:[#allocation8 + $0x2c0] sm:$0xff]  ;;  %v1198_v60 = vld [vmem:[#allocation8 + $0x148] sm:$0xff] }
 0x13d   :  { %v466_v17 = vld [vmem:[#allocation5 + $0xa58] sm:$0xff]  ;;  %1106 = vmatpush.msra.mxu1 %v402_v16  ;;  %v1321_v16 = vld [vmem:[#allocation8 + $0x520] sm:$0xff]  ;;  %v1194_v2 = vld [vmem:[#allocation8 + $0x128] sm:$0xff] }
 0x13e   :  { %v534_v18 = vld [vmem:[#allocation5 + $0xc78] sm:$0xff]  ;;  %1126 = vmatpush.msra.mxu2 %v466_v17  ;;  %v691_v17 = vadd.f32 %v2251_v40, %v671_v8  ;;  %v1305_v40 = vld [vmem:[#allocation8 + $0x4a0] sm:$0xff] }
 0x13f   :  { %v1930_v21 = vld [vmem:[#allocation2 + $0x10] sm:$0xff]  ;;  %1145 = vmatpush.msra.mxu3 %v534_v18  ;;  %v811_v18 = vadd.f32 %v810_v12, %v791_v9  ;;  %v1289_v55 = vld [vmem:[#allocation8 + $0x420] sm:$0xff]  ;;  %v1330_v9 = vld [vmem:[#allocation8 + $0x568] sm:$0xff] }
 0x140   :  { %1069 = vmatmul.f32.vlgmr.msrb.gmra.mxu3 %v1930_v21  ;;  %v334_v22 = vld [vmem:[#allocation5 + $0x638] sm:$0xff]  ;;  %v1241_v21 = vld [vmem:[#allocation8 + $0x2a0] sm:$0xff]  ;;  %v711_v30 = vadd.f32 %v2254_v47, %v691_v17  ;;  %v1322_v17 = vld [vmem:[#allocation8 + $0x528] sm:$0xff] }
 0x141   :  { %v398_v23 = vld [vmem:[#allocation5 + $0x838] sm:$0xff]  ;;  %1087 = vmatpush.msra.mxu0 %v334_v22  ;;  %v830_v22 = vpop.f32.mrf.mxu3  ;;  %v1297_v47 = vld [vmem:[#allocation8 + $0x460] sm:$0xff] }
 0x142   :  { %v462_v25 = vld [vmem:[#allocation5 + $0xa38] sm:$0xff]  ;;  %1107 = vmatpush.msra.mxu1 %v398_v23  ;;  %v1317_v23 = vld [vmem:[#allocation8 + $0x500] sm:$0xff] }
 0x143   :  { %v530_v26 = vld [vmem:[#allocation5 + $0xc58] sm:$0xff]  ;;  %1127 = vmatpush.msra.mxu2 %v462_v25  ;;  %v1173_v25 = vld [vmem:[#allocation8 + $0x80] sm:$0xff] }
 0x144   :  { %v330_v31 = vld [vmem:[#allocation5 + $0x618] sm:$0xff]  ;;  %1146 = vmatpush.msra.mxu3 %v530_v26  ;;  %v1237_v26 = vld [vmem:[#allocation8 + $0x280] sm:$0xff] }
 0x145   :  { %v394_v32 = vld [vmem:[#allocation5 + $0x818] sm:$0xff]  ;;  %1088 = vmatpush.msra.mxu0 %v330_v31  ;;  %v831_v31 = vadd.f32 %v830_v22, %v811_v18  ;;  %v1409_v8 = vld [vmem:[#allocation8 + $0x7e0] sm:$0xff]  ;;  %v1178_v18 = vld [vmem:[#allocation8 + $0xa8] sm:$0xff] }
 0x146   :  { %v458_v33 = vld [vmem:[#allocation5 + $0xa18] sm:$0xff]  ;;  %1108 = vmatpush.msra.mxu1 %v394_v32  ;;  %1089 = vmatmul.f32.vlgmr.msra.gmra.mxu0 %v1933_v43  ;;  %v1169_v32 = vld [vmem:[#allocation8 + $0x60] sm:$0xff]  ;;  %v1318_v22 = vld [vmem:[#allocation8 + $0x508] sm:$0xff] }
 0x147   :  { %v526_v34 = vld [vmem:[#allocation5 + $0xc38] sm:$0xff]  ;;  %1128 = vmatpush.msra.mxu2 %v458_v33  ;;  %1423 = vmatpush.msrb.mxu0 %v1217_v36  ;;  %v1233_v33 = vld [vmem:[#allocation8 + $0x260] sm:$0xff] }
 0x148   :  { %v522_v39 = vld [vmem:[#allocation5 + $0xc18] sm:$0xff]  ;;  %1147 = vmatpush.msra.mxu3 %v526_v34  ;;  %1129 = vmatmul.f32.vlgmr.msra.gmra.mxu2 %v1932_v63  ;;  %v1165_v36 = vld [vmem:[#allocation8 + $0x40] sm:$0xff]  ;;  %v731_v63 = vadd.f32 %v2256_v1, %v711_v30  ;;  %v1206_v1 = vld [vmem:[#allocation8 + $0x188] sm:$0xff] }
 0x149   :  { %1443 = vmatpush.msrb.mxu1 %v1281_v38  ;;  %v1934_v44 = vld [vmem:[#allocation2 + $0x30] sm:$0xff]  ;;  %1424 = vmatpush.msrb.mxu0 %v1213_v41  ;;  %v1161_v41 = vld [vmem:[#allocation8 + $0x20] sm:$0xff]  ;;  %v1170_v30 = vld [vmem:[#allocation8 + $0x68] sm:$0xff] }
 0x14a   :  { %1148 = vmatpush.msra.mxu3 %v522_v39  ;;  %1109 = vmatmul.f32.vlgmr.msra.gmra.mxu1 %v1935_v49  ;;  %v1301_v43 = vld [vmem:[#allocation8 + $0x480] sm:$0xff]  ;;  %v2264_v48 = vmax.f32 %v731_v63, 0.0  ;;  %v1218_v49 = vld [vmem:[#allocation8 + $0x1e8] sm:$0xff] }
 0x14b   :  { %1149 = vmatmul.f32.vlgmr.msra.gmra.mxu3 %v1934_v44  ;;  %1444 = vmatpush.msrb.mxu1 %v1277_v19  ;;  %v1225_v19 = vld [vmem:[#allocation8 + $0x220] sm:$0xff]  ;;  %v1302_v63 = vld [vmem:[#allocation8 + $0x488] sm:$0xff] }
 0x14c   :  { %1425 = vmatpush.msrb.mxu0 %v1209_v0  ;;  %1463 = vmatpush.msrb.mxu2 %v1345_v52  ;;  %v1157_v44 = vld [vmem:[#allocation8] sm:$0xff]  ;;  %v1274_v52 = vld [vmem:[#allocation8 + $0x3a8] sm:$0xff] }
 0x14d   :  { %1445 = vmatpush.msrb.mxu1 %v1273_v45  ;;  %v1221_v0 = vld [vmem:[#allocation8 + $0x200] sm:$0xff]  ;;  %v1282_v45 = vld [vmem:[#allocation8 + $0x3e8] sm:$0xff]  ;;  %1483 = vmatpush.msrb.mxu3 %v1409_v8  ;;  %v1255_v8 = vld [vmem:[#allocation8 + $0x310] sm:$0xff] }
 0x14e   :  { %1426 = vmatpush.msrb.mxu0 %v1205_v50  ;;  %1464 = vmatpush.msrb.mxu2 %v1341_v56  ;;  %v1278_v50 = vld [vmem:[#allocation8 + $0x3c8] sm:$0xff]  ;;  %v1285_v56 = vld [vmem:[#allocation8 + $0x400] sm:$0xff] }
 0x14f   :  { %1446 = vmatpush.msrb.mxu1 %v1269_v51  ;;  %v1214_v51 = vld [vmem:[#allocation8 + $0x1c8] sm:$0xff]  ;;  %v1405_v12 = vld [vmem:[#allocation8 + $0x7c0] sm:$0xff] }
 0x150   :  { %1427 = vmatpush.msrb.mxu0 %v1201_v53  ;;  %1465 = vmatpush.msrb.mxu2 %v1337_v59  ;;  %v850_v34 = vpop.f32.mrf.mxu0  ;;  %v1210_v53 = vld [vmem:[#allocation8 + $0x1a8] sm:$0xff] }
 0x151   :  { %1447 = vmatpush.msrb.mxu1 %v1265_v54  ;;  %v851_v38 = vadd.f32 %v850_v34, %v831_v31  ;;  %v1270_v54 = vld [vmem:[#allocation8 + $0x388] sm:$0xff]  ;;  %1484 = vmatpush.msrb.mxu3 %v1405_v12  ;;  %v1349_v12 = vld [vmem:[#allocation8 + $0x600] sm:$0xff] }
 0x152   :  { %1428 = vmatpush.msrb.mxu0 %v1197_v57  ;;  %1466 = vmatpush.msrb.mxu2 %v1333_v3  ;;  %v870_v39 = vpop.f32.mrf.mxu1  ;;  %v1346_v57 = vld [vmem:[#allocation8 + $0x5e8] sm:$0xff] }
 0x153   :  { %1448 = vmatpush.msrb.mxu1 %v1261_v58  ;;  %v871_v42 = vadd.f32 %v870_v39, %v851_v38  ;;  %v1202_v58 = vld [vmem:[#allocation8 + $0x168] sm:$0xff] }
 0x154   :  { %1429 = vmatpush.msrb.mxu0 %v1193_v61  ;;  %1467 = vmatpush.msrb.mxu2 %v1329_v6  ;;  %v1262_v59 = vld [vmem:[#allocation8 + $0x348] sm:$0xff] }
 0x155   :  { %1449 = vmatpush.msrb.mxu1 %v1257_v62  ;;  %v2262_v46 = vmax.f32 %v871_v42, 0.0  ;;  %v1258_v61 = vld [vmem:[#allocation8 + $0x328] sm:$0xff]  ;;  %v1377_v42 = vld [vmem:[#allocation8 + $0x6e0] sm:$0xff] }
 0x156   :  { %1430 = vmatpush.msrb.mxu0 %v1189_v4  ;;  %1468 = vmatpush.msrb.mxu2 %v1325_v13  ;;  %v1338_v62 = vld [vmem:[#allocation8 + $0x5a8] sm:$0xff] }
 0x157   :  { %1450 = vmatpush.msrb.mxu1 %v1253_v5  ;;  %v1254_v3 = vld [vmem:[#allocation8 + $0x308] sm:$0xff] }
 0x158   :  { %1431 = vmatpush.msrb.mxu0 %v1185_v10  ;;  %1469 = vmatpush.msrb.mxu2 %v1321_v16  ;;  %v1334_v4 = vld [vmem:[#allocation8 + $0x588] sm:$0xff]  ;;  %v1401_v16 = vld [vmem:[#allocation8 + $0x7a0] sm:$0xff] }
 0x159   :  { %1451 = vmatpush.msrb.mxu1 %v1249_v11  ;;  %v1190_v5 = vld [vmem:[#allocation8 + $0x108] sm:$0xff]  ;;  %1485 = vmatpush.msrb.mxu3 %v1401_v16 }
 0x15a   :  { %1432 = vmatpush.msrb.mxu0 %v1181_v14  ;;  %1470 = vmatpush.msrb.mxu2 %v1317_v23  ;;  %v1250_v6 = vld [vmem:[#allocation8 + $0x2e8] sm:$0xff] }
 0x15b   :  { %1452 = vmatpush.msrb.mxu1 %v1245_v15  ;;  %v1186_v10 = vld [vmem:[#allocation8 + $0xe8] sm:$0xff] }
 0x15c   :  { %1433 = vmatpush.msrb.mxu0 %v1177_v20  ;;  %1471 = vmatpush.msrb.mxu2 %v1313_v28  ;;  %v1246_v11 = vld [vmem:[#allocation8 + $0x2c8] sm:$0xff] }
 0x15d   :  { %1453 = vmatpush.msrb.mxu1 %v1241_v21  ;;  %v1326_v13 = vld [vmem:[#allocation8 + $0x548] sm:$0xff]  ;;  %v1397_v21 = vld [vmem:[#allocation8 + $0x780] sm:$0xff] }
 0x15e   :  { %1434 = vmatpush.msrb.mxu0 %v1173_v25  ;;  %1472 = vmatpush.msrb.mxu2 %v1309_v35  ;;  %v1182_v14 = vld [vmem:[#allocation8 + $0xc8] sm:$0xff] }
 0x15f   :  { %1454 = vmatpush.msrb.mxu1 %v1237_v26  ;;  %v1242_v15 = vld [vmem:[#allocation8 + $0x2a8] sm:$0xff]  ;;  %1486 = vmatpush.msrb.mxu3 %v1397_v21  ;;  %v1393_v26 = vld [vmem:[#allocation8 + $0x760] sm:$0xff]  ;;  %v1243_v21 = vld [vmem:[#allocation8 + $0x2b0] sm:$0xff] }
 0x160   :  { %1435 = vmatpush.msrb.mxu0 %v1169_v32  ;;  %1473 = vmatpush.msrb.mxu2 %v1305_v40  ;;  %v1238_v20 = vld [vmem:[#allocation8 + $0x288] sm:$0xff]  ;;  %v1389_v32 = vld [vmem:[#allocation8 + $0x740] sm:$0xff] }
 0x161   :  { %1455 = vmatpush.msrb.mxu1 %v1233_v33  ;;  %v1174_v23 = vld [vmem:[#allocation8 + $0x88] sm:$0xff]  ;;  %1487 = vmatpush.msrb.mxu3 %v1393_v26  ;;  %v1381_v40 = vld [vmem:[#allocation8 + $0x700] sm:$0xff] }
 0x162   :  { %1436 = vmatpush.msrb.mxu0 %v1165_v36  ;;  %1474 = vmatpush.msrb.mxu2 %v1301_v43  ;;  %v1234_v25 = vld [vmem:[#allocation8 + $0x268] sm:$0xff]  ;;  %v1385_v36 = vld [vmem:[#allocation8 + $0x720] sm:$0xff]  ;;  %v1219_v43 = vld [vmem:[#allocation8 + $0x1f0] sm:$0xff] }
 0x163   :  { %1456 = vmatpush.msrb.mxu1 %v1229_v37  ;;  %v1314_v28 = vld [vmem:[#allocation8 + $0x4e8] sm:$0xff]  ;;  %1488 = vmatpush.msrb.mxu3 %v1389_v32  ;;  %v1235_v32 = vld [vmem:[#allocation8 + $0x270] sm:$0xff] }
 0x164   :  { %1437 = vmatpush.msrb.mxu0 %v1161_v41  ;;  %1475 = vmatpush.msrb.mxu2 %v1297_v47  ;;  %v1230_v31 = vld [vmem:[#allocation8 + $0x248] sm:$0xff]  ;;  %v1275_v47 = vld [vmem:[#allocation8 + $0x3b0] sm:$0xff] }
 0x165   :  { %1457 = vmatpush.msrb.mxu1 %v1225_v19  ;;  %v1310_v33 = vld [vmem:[#allocation8 + $0x4c8] sm:$0xff]  ;;  %1489 = vmatpush.msrb.mxu3 %v1385_v36  ;;  %v1283_v19 = vld [vmem:[#allocation8 + $0x3f0] sm:$0xff] }
 0x166   :  { %1438 = vmatpush.msrb.mxu0 %v1157_v44  ;;  %1476 = vmatpush.msrb.mxu2 %v1293_v24  ;;  %v1166_v34 = vld [vmem:[#allocation8 + $0x48] sm:$0xff]  ;;  %v1271_v24 = vld [vmem:[#allocation8 + $0x390] sm:$0xff] }
 0x167   :  { %1458 = vmatpush.msrb.mxu1 %v1221_v0  ;;  %1439 = vmatmul.f32.vlgmr.msrb.gmra.mxu0 %v2264_v48  ;;  %v1226_v35 = vld [vmem:[#allocation8 + $0x228] sm:$0xff]  ;;  %v1279_v0 = vld [vmem:[#allocation8 + $0x3d0] sm:$0xff] }
 0x168   :  { %1503 = vmatpush.msra.mxu0 %v1218_v49  ;;  %1459 = vmatmul.f32.vlgmr.msrb.gmra.mxu1 %v2262_v46  ;;  %v1306_v37 = vld [vmem:[#allocation8 + $0x4a8] sm:$0xff]  ;;  %v1373_v49 = vld [vmem:[#allocation8 + $0x6c0] sm:$0xff] }
 0x169   :  { %1523 = vmatpush.msra.mxu1 %v1282_v45  ;;  %1477 = vmatpush.msrb.mxu2 %v1289_v55  ;;  %v1162_v38 = vld [vmem:[#allocation8 + $0x28] sm:$0xff]  ;;  %v1215_v45 = vld [vmem:[#allocation8 + $0x1d0] sm:$0xff] }
 0x16a   :  { %1504 = vmatpush.msra.mxu0 %v1214_v51  ;;  %v1222_v39 = vld [vmem:[#allocation8 + $0x208] sm:$0xff]  ;;  %1490 = vmatpush.msrb.mxu3 %v1381_v40  ;;  %v1211_v51 = vld [vmem:[#allocation8 + $0x1b0] sm:$0xff] }
 0x16b   :  { %1524 = vmatpush.msra.mxu1 %v1278_v50  ;;  %1478 = vmatpush.msrb.mxu2 %v1285_v56  ;;  %v1158_v41 = vld [vmem:[#allocation8 + $0x8] sm:$0xff]  ;;  %v1365_v56 = vld [vmem:[#allocation8 + $0x680] sm:$0xff]  ;;  %v1227_v40 = vld [vmem:[#allocation8 + $0x230] sm:$0xff] }
 0x16c   :  { %1505 = vmatpush.msra.mxu0 %v1210_v53  ;;  %1491 = vmatpush.msrb.mxu3 %v1377_v42  ;;  %v1298_v44 = vld [vmem:[#allocation8 + $0x468] sm:$0xff]  ;;  %v1223_v42 = vld [vmem:[#allocation8 + $0x210] sm:$0xff] }
 0x16d   :  { %1525 = vmatpush.msra.mxu1 %v1274_v52  ;;  %1543 = vmatpush.msra.mxu2 %v1346_v57  ;;  %v1294_v50 = vld [vmem:[#allocation8 + $0x448] sm:$0xff]  ;;  %v587_v52 = vperm.slane %v2246_v27, 2 }
 0x16e   :  { %1506 = vmatpush.msra.mxu0 %v1206_v1  ;;  %1492 = vmatpush.msrb.mxu3 %v1373_v49  ;;  %v1290_v55 = vld [vmem:[#allocation8 + $0x428] sm:$0xff]  ;;  %v1207_v1 = vld [vmem:[#allocation8 + $0x190] sm:$0xff]  ;;  %v1220_v49 = vld [vmem:[#allocation8 + $0x1f8] sm:$0xff] }
 0x16f   :  { %1526 = vmatpush.msra.mxu1 %v1270_v54  ;;  %1544 = vmatpush.msra.mxu2 %v1342_v7  ;;  %v1369_v54 = vld [vmem:[#allocation8 + $0x6a0] sm:$0xff]  ;;  %v1286_v57 = vld [vmem:[#allocation8 + $0x408] sm:$0xff] }
 0x170   :  { %1507 = vmatpush.msra.mxu0 %v1202_v58  ;;  %1493 = vmatpush.msrb.mxu3 %v1369_v54  ;;  %v1276_v54 = vld [vmem:[#allocation8 + $0x3b8] sm:$0xff] }
 0x171   :  { %1527 = vmatpush.msra.mxu1 %v1266_v29  ;;  %1545 = vmatpush.msra.mxu2 %v1338_v62  ;;  %v1267_v29 = vld [vmem:[#allocation8 + $0x370] sm:$0xff] }
 0x172   :  { %1508 = vmatpush.msra.mxu0 %v1198_v60  ;;  %1494 = vmatpush.msrb.mxu3 %v1365_v56  ;;  %v1263_v60 = vld [vmem:[#allocation8 + $0x350] sm:$0xff]  ;;  %v1272_v56 = vld [vmem:[#allocation8 + $0x398] sm:$0xff] }
 0x173   :  { %1528 = vmatpush.msra.mxu1 %v1262_v59  ;;  %1546 = vmatpush.msra.mxu2 %v1334_v4  ;;  %v1203_v59 = vld [vmem:[#allocation8 + $0x170] sm:$0xff] }
 0x174   :  { %1509 = vmatpush.msra.mxu0 %v1194_v2  ;;  %v1199_v62 = vld [vmem:[#allocation8 + $0x150] sm:$0xff] }
 0x175   :  { %1529 = vmatpush.msra.mxu1 %v1258_v61  ;;  %1547 = vmatpush.msra.mxu2 %v1330_v9  ;;  %v890_v53 = vpop.f32.mrf.mxu2  ;;  %v1361_v61 = vld [vmem:[#allocation8 + $0x660] sm:$0xff]  ;;  %v1259_v2 = vld [vmem:[#allocation8 + $0x330] sm:$0xff] }
 0x176   :  { %1510 = vmatpush.msra.mxu0 %v1190_v5  ;;  %v891_v58 = vadd.f32 %v890_v53, %v587_v52  ;;  %v910_v7 = vpop.f32.mrf.mxu3  ;;  %1495 = vmatpush.msrb.mxu3 %v1361_v61  ;;  %v1195_v5 = vld [vmem:[#allocation8 + $0x130] sm:$0xff]  ;;  %v1353_v9 = vld [vmem:[#allocation8 + $0x620] sm:$0xff]  ;;  %v1378_v53 = vld [vmem:[#allocation8 + $0x6e8] sm:$0xff] }
 0x177   :  { %1530 = vmatpush.msra.mxu1 %v1254_v3  ;;  %1548 = vmatpush.msra.mxu2 %v1326_v13  ;;  %v1357_v3 = vld [vmem:[#allocation8 + $0x640] sm:$0xff]  ;;  %v1410_v13 = vld [vmem:[#allocation8 + $0x7e8] sm:$0xff]  ;;  %v1347_v52 = vld [vmem:[#allocation8 + $0x5f0] sm:$0xff] }
 0x178   :  { %1511 = vmatpush.msra.mxu0 %v1186_v10  ;;  %v911_v4 = vadd.f32 %v910_v7, %v891_v58  ;;  %1496 = vmatpush.msrb.mxu3 %v1357_v3  ;;  %v1191_v10 = vld [vmem:[#allocation8 + $0x110] sm:$0xff]  ;;  %v1208_v58 = vld [vmem:[#allocation8 + $0x198] sm:$0xff] }
 0x179   :  { %1531 = vmatpush.msra.mxu1 %v1250_v6  ;;  %1549 = vmatpush.msra.mxu2 %v1322_v17  ;;  %v930_v6 = vpop.f32.mrf.mxu0  ;;  %v1247_v17 = vld [vmem:[#allocation8 + $0x2d0] sm:$0xff]  ;;  %v1268_v7 = vld [vmem:[#allocation8 + $0x378] sm:$0xff] }
 0x17a   :  { %1512 = vmatpush.msra.mxu0 %v1182_v14  ;;  %1497 = vmatpush.msrb.mxu3 %v1353_v9  ;;  %v931_v14 = vadd.f32 %v930_v6, %v911_v4  ;;  %v1204_v61 = vld [vmem:[#allocation8 + $0x178] sm:$0xff]  ;;  %v1366_v4 = vld [vmem:[#allocation8 + $0x688] sm:$0xff]  ;;  %v1327_v6 = vld [vmem:[#allocation8 + $0x550] sm:$0xff] }
 0x17b   :  { %1532 = vmatpush.msra.mxu1 %v1246_v11  ;;  %1550 = vmatpush.msra.mxu2 %v1318_v22  ;;  %v1251_v11 = vld [vmem:[#allocation8 + $0x2f0] sm:$0xff]  ;;  %v1402_v22 = vld [vmem:[#allocation8 + $0x7a8] sm:$0xff]  ;;  %v1200_v3 = vld [vmem:[#allocation8 + $0x158] sm:$0xff] }
 0x17c   :  { %1513 = vmatpush.msra.mxu0 %v1178_v18  ;;  %1498 = vmatpush.msrb.mxu3 %v1349_v12  ;;  %v1406_v18 = vld [vmem:[#allocation8 + $0x7c8] sm:$0xff]  ;;  %v1192_v12 = vld [vmem:[#allocation8 + $0x118] sm:$0xff] }
 0x17d   :  { %1533 = vmatpush.msra.mxu1 %v1242_v15  ;;  %1551 = vmatpush.msra.mxu2 %v1314_v28  ;;  %v1187_v15 = vld [vmem:[#allocation8 + $0xf0] sm:$0xff]  ;;  %v1362_v9 = vld [vmem:[#allocation8 + $0x668] sm:$0xff] }
 0x17e   :  { %1514 = vmatpush.msra.mxu0 %v1174_v23  ;;  %1563 = vmatpush.msra.mxu3 %v1410_v13  ;;  %v1239_v28 = vld [vmem:[#allocation8 + $0x290] sm:$0xff]  ;;  %v1358_v13 = vld [vmem:[#allocation8 + $0x648] sm:$0xff] }
 0x17f   :  { %1534 = vmatpush.msra.mxu1 %v1238_v20  ;;  %1552 = vmatpush.msra.mxu2 %v1310_v33  ;;  %v950_v16 = vpop.f32.mrf.mxu1  ;;  %v1183_v20 = vld [vmem:[#allocation8 + $0xd0] sm:$0xff]  ;;  %v1394_v33 = vld [vmem:[#allocation8 + $0x768] sm:$0xff] }
 0x180   :  { %1515 = vmatpush.msra.mxu0 %v1170_v30  ;;  %1564 = vmatpush.msra.mxu3 %v1406_v18  ;;  %v951_v23 = vadd.f32 %v950_v16, %v931_v14  ;;  %v970_v26 = vpop.f32.mrf.mxu2  ;;  %v1398_v30 = vld [vmem:[#allocation8 + $0x788] sm:$0xff]  ;;  %v1252_v14 = vld [vmem:[#allocation8 + $0x2f8] sm:$0xff] }
 0x181   :  { %1535 = vmatpush.msra.mxu1 %v1234_v25  ;;  %1553 = vmatpush.msra.mxu2 %v1306_v37  ;;  %v1179_v25 = vld [vmem:[#allocation8 + $0xb0] sm:$0xff]  ;;  %v1188_v16 = vld [vmem:[#allocation8 + $0xf8] sm:$0xff] }
 0x182   :  { %1516 = vmatpush.msra.mxu0 %v1166_v34  ;;  %1565 = vmatpush.msra.mxu3 %v1402_v22  ;;  %v971_v34 = vadd.f32 %v970_v26, %v951_v23  ;;  %v1231_v37 = vld [vmem:[#allocation8 + $0x250] sm:$0xff]  ;;  %v1248_v18 = vld [vmem:[#allocation8 + $0x2d8] sm:$0xff]  ;;  %v1350_v22 = vld [vmem:[#allocation8 + $0x608] sm:$0xff] }
 0x183   :  { %1536 = vmatpush.msra.mxu1 %v1230_v31  ;;  %1554 = vmatpush.msra.mxu2 %v1302_v63  ;;  %v1175_v31 = vld [vmem:[#allocation8 + $0x90] sm:$0xff]  ;;  %v990_v36 = vpop.f32.mrf.mxu3  ;;  %v1386_v63 = vld [vmem:[#allocation8 + $0x728] sm:$0xff]  ;;  %v1244_v23 = vld [vmem:[#allocation8 + $0x2b8] sm:$0xff] }
 0x184   :  { %1517 = vmatpush.msra.mxu0 %v1162_v38  ;;  %1566 = vmatpush.msra.mxu3 %v1398_v30  ;;  %v1390_v38 = vld [vmem:[#allocation8 + $0x748] sm:$0xff]  ;;  %v1180_v26 = vld [vmem:[#allocation8 + $0xb8] sm:$0xff]  ;;  %v1307_v30 = vld [vmem:[#allocation8 + $0x4b0] sm:$0xff] }
 0x185   :  { %1537 = vmatpush.msra.mxu1 %v1226_v35  ;;  %1555 = vmatpush.msra.mxu2 %v1298_v44  ;;  %v1171_v35 = vld [vmem:[#allocation8 + $0x70] sm:$0xff]  ;;  %v1382_v44 = vld [vmem:[#allocation8 + $0x708] sm:$0xff] }
 0x186   :  { %1518 = vmatpush.msra.mxu0 %v1158_v41  ;;  %1567 = vmatpush.msra.mxu3 %v1394_v33  ;;  %v991_v41 = vadd.f32 %v990_v36, %v971_v34  ;;  %v588_v33 = vperm.slane %v2246_v27, 3  ;;  %v1303_v34 = vld [vmem:[#allocation8 + $0x490] sm:$0xff]  ;;  %v1232_v36 = vld [vmem:[#allocation8 + $0x258] sm:$0xff] }
 0x187   :  { %1538 = vmatpush.msra.mxu1 %v1222_v39  ;;  %1519 = vmatmul.f32.vlgmr.msra.gmra.mxu0 %v2264_v48  ;;  %v1167_v39 = vld [vmem:[#allocation8 + $0x50] sm:$0xff] }
 0x188   :  { %1539 = vmatmul.f32.vlgmr.msra.gmra.mxu1 %v2262_v46  ;;  %1583 = vmatpush.msrb.mxu0 %v1219_v43 }
 0x189   :  { %1603 = vmatpush.msrb.mxu1 %v1283_v19  ;;  %1556 = vmatpush.msra.mxu2 %v1294_v50  ;;  %v1163_v19 = vld [vmem:[#allocation8 + $0x30] sm:$0xff] }
 0x18a   :  { %1584 = vmatpush.msrb.mxu0 %v1215_v45  ;;  %1568 = vmatpush.msra.mxu3 %v1390_v38  ;;  %v1168_v38 = vld [vmem:[#allocation8 + $0x58] sm:$0xff] }
 0x18b   :  { %1604 = vmatpush.msrb.mxu1 %v1279_v0  ;;  %1557 = vmatpush.msra.mxu2 %v1290_v55  ;;  %v1159_v0 = vld [vmem:[#allocation8 + $0x10] sm:$0xff] }
 0x18c   :  { %1585 = vmatpush.msrb.mxu0 %v1211_v51  ;;  %1569 = vmatpush.msra.mxu3 %v1386_v63  ;;  %v1280_v51 = vld [vmem:[#allocation8 + $0x3d8] sm:$0xff]  ;;  %v1343_v55 = vld [vmem:[#allocation8 + $0x5d0] sm:$0xff] }
 0x18d   :  { %1605 = vmatpush.msrb.mxu1 %v1275_v47  ;;  %1558 = vmatpush.msra.mxu2 %v1286_v57  ;;  %v1284_v47 = vld [vmem:[#allocation8 + $0x3f8] sm:$0xff]  ;;  %v1339_v57 = vld [vmem:[#allocation8 + $0x5b0] sm:$0xff] }
 0x18e   :  { %1586 = vmatpush.msrb.mxu0 %v1207_v1  ;;  %1570 = vmatpush.msra.mxu3 %v1382_v44  ;;  %v1212_v1 = vld [vmem:[#allocation8 + $0x1b8] sm:$0xff]  ;;  %v1291_v44 = vld [vmem:[#allocation8 + $0x430] sm:$0xff] }
 0x18f   :  { %1606 = vmatpush.msrb.mxu1 %v1271_v24  ;;  %v1216_v24 = vld [vmem:[#allocation8 + $0x1d8] sm:$0xff] }
 0x190   :  { %1587 = vmatpush.msrb.mxu0 %v1203_v59  ;;  %1571 = vmatpush.msra.mxu3 %v1378_v53  ;;  %v1370_v59 = vld [vmem:[#allocation8 + $0x6a8] sm:$0xff]  ;;  %v1228_v63 = vld [vmem:[#allocation8 + $0x238] sm:$0xff] }
 0x191   :  { %1607 = vmatpush.msrb.mxu1 %v1267_v29  ;;  %v1374_v29 = vld [vmem:[#allocation8 + $0x6c8] sm:$0xff] }
 0x192   :  { %1588 = vmatpush.msrb.mxu0 %v1199_v62  ;;  %1572 = vmatpush.msra.mxu3 %v1374_v29  ;;  %v1264_v62 = vld [vmem:[#allocation8 + $0x358] sm:$0xff] }
 0x193   :  { %1608 = vmatpush.msrb.mxu1 %v1263_v60  ;;  %v1335_v60 = vld [vmem:[#allocation8 + $0x590] sm:$0xff]  ;;  %v1340_v29 = vld [vmem:[#allocation8 + $0x5b8] sm:$0xff] }
 0x194   :  { %1589 = vmatpush.msrb.mxu0 %v1195_v5  ;;  %v1010_v43 = vpop.f32.mrf.mxu0  ;;  %1573 = vmatpush.msra.mxu3 %v1370_v59  ;;  %v1260_v5 = vld [vmem:[#allocation8 + $0x338] sm:$0xff] }
 0x195   :  { %1609 = vmatpush.msrb.mxu1 %v1259_v2  ;;  %v1011_v45 = vadd.f32 %v1010_v43, %v991_v41  ;;  %v1331_v2 = vld [vmem:[#allocation8 + $0x570] sm:$0xff]  ;;  %v1224_v43 = vld [vmem:[#allocation8 + $0x218] sm:$0xff] }
 0x196   :  { %1590 = vmatpush.msrb.mxu0 %v1191_v10  ;;  %v1256_v10 = vld [vmem:[#allocation8 + $0x318] sm:$0xff]  ;;  %1574 = vmatpush.msra.mxu3 %v1366_v4  ;;  %v1399_v4 = vld [vmem:[#allocation8 + $0x790] sm:$0xff] }
 0x197   :  { %1610 = vmatpush.msrb.mxu1 %v1255_v8  ;;  %v2271_v50 = vmax.f32 %v1011_v45, 0.0  ;;  %v1196_v8 = vld [vmem:[#allocation8 + $0x138] sm:$0xff] }
 0x198   :  { %1591 = vmatpush.msrb.mxu0 %v1187_v15  ;;  %v1319_v15 = vld [vmem:[#allocation8 + $0x510] sm:$0xff]  ;;  %1575 = vmatpush.msra.mxu3 %v1362_v9 }
 0x199   :  { %1611 = vmatpush.msrb.mxu1 %v1251_v11  ;;  %1479 = vmatmul.f32.vlgmr.msrb.gmra.mxu2 %v2271_v50  ;;  %v1323_v11 = vld [vmem:[#allocation8 + $0x530] sm:$0xff] }
 0x19a   :  { %1592 = vmatpush.msrb.mxu0 %v1183_v20  ;;  %1623 = vmatpush.msrb.mxu2 %v1347_v52  ;;  %v1315_v20 = vld [vmem:[#allocation8 + $0x4f0] sm:$0xff]  ;;  %v1348_v52 = vld [vmem:[#allocation8 + $0x5f8] sm:$0xff] }
 0x19b   :  { %1612 = vmatpush.msrb.mxu1 %v1247_v17  ;;  %v1354_v17 = vld [vmem:[#allocation8 + $0x628] sm:$0xff]  ;;  %1576 = vmatpush.msra.mxu3 %v1358_v13  ;;  %v1391_v9 = vld [vmem:[#allocation8 + $0x750] sm:$0xff] }
 0x19c   :  { %1593 = vmatpush.msrb.mxu0 %v1179_v25  ;;  %1624 = vmatpush.msrb.mxu2 %v1343_v55  ;;  %v1311_v25 = vld [vmem:[#allocation8 + $0x4d0] sm:$0xff] }
 0x19d   :  { %1613 = vmatpush.msrb.mxu1 %v1243_v21  ;;  %v1184_v21 = vld [vmem:[#allocation8 + $0xd8] sm:$0xff]  ;;  %1577 = vmatpush.msra.mxu3 %v1354_v17  ;;  %v1383_v13 = vld [vmem:[#allocation8 + $0x710] sm:$0xff] }
 0x19e   :  { %1594 = vmatpush.msrb.mxu0 %v1175_v31  ;;  %1625 = vmatpush.msrb.mxu2 %v1339_v57  ;;  %v1176_v31 = vld [vmem:[#allocation8 + $0x98] sm:$0xff]  ;;  %v1375_v17 = vld [vmem:[#allocation8 + $0x6d0] sm:$0xff] }
 0x19f   :  { %1614 = vmatpush.msrb.mxu1 %v1239_v28  ;;  %v1240_v28 = vld [vmem:[#allocation8 + $0x298] sm:$0xff]  ;;  %1578 = vmatpush.msra.mxu3 %v1350_v22  ;;  %v1367_v22 = vld [vmem:[#allocation8 + $0x690] sm:$0xff] }
 0x1a0   :  { %1595 = vmatpush.msrb.mxu0 %v1171_v35  ;;  %1626 = vmatpush.msrb.mxu2 %v1335_v60  ;;  %v1172_v35 = vld [vmem:[#allocation8 + $0x78] sm:$0xff] }
 0x1a1   :  { %1615 = vmatpush.msrb.mxu1 %v1235_v32  ;;  %1559 = vmatmul.f32.vlgmr.msra.gmra.mxu2 %v2271_v50  ;;  %v1236_v32 = vld [vmem:[#allocation8 + $0x278] sm:$0xff] }
 0x1a2   :  { %1596 = vmatpush.msrb.mxu0 %v1167_v39  ;;  %1627 = vmatpush.msrb.mxu2 %v1331_v2  ;;  %v1328_v60 = vld [vmem:[#allocation8 + $0x558] sm:$0xff]  ;;  %v1403_v2 = vld [vmem:[#allocation8 + $0x7b0] sm:$0xff] }
 0x1a3   :  { %1616 = vmatpush.msrb.mxu1 %v1231_v37  ;;  %v1299_v37 = vld [vmem:[#allocation8 + $0x470] sm:$0xff] }
 0x1a4   :  { %1597 = vmatpush.msrb.mxu0 %v1163_v19  ;;  %1628 = vmatpush.msrb.mxu2 %v1327_v6  ;;  %v1295_v19 = vld [vmem:[#allocation8 + $0x450] sm:$0xff] }
 0x1a5   :  { %1617 = vmatpush.msrb.mxu1 %v1227_v40  ;;  %v1395_v6 = vld [vmem:[#allocation8 + $0x770] sm:$0xff] }
 0x1a6   :  { %1598 = vmatpush.msrb.mxu0 %v1159_v0  ;;  %1629 = vmatpush.msrb.mxu2 %v1323_v11  ;;  %v1030_v39 = vpop.f32.mrf.mxu1  ;;  %v1160_v0 = vld [vmem:[#allocation8 + $0x18] sm:$0xff]  ;;  %v1387_v11 = vld [vmem:[#allocation8 + $0x730] sm:$0xff] }
 0x1a7   :  { %1618 = vmatpush.msrb.mxu1 %v1223_v42  ;;  %1599 = vmatmul.f32.vlgmr.msrb.gmra.mxu0 %v2264_v48  ;;  %v1031_v40 = vadd.f32 %v1030_v39, %v588_v33  ;;  %v1164_v42 = vld [vmem:[#allocation8 + $0x38] sm:$0xff] }
 0x1a8   :  { %1619 = vmatmul.f32.vlgmr.msrb.gmra.mxu1 %v2262_v46  ;;  %1663 = vmatpush.msra.mxu0 %v1220_v49  ;;  %v1287_v49 = vld [vmem:[#allocation8 + $0x410] sm:$0xff]  ;;  %v1400_v33 = vld [vmem:[#allocation8 + $0x798] sm:$0xff] }
 0x1a9   :  { %1683 = vmatpush.msra.mxu1 %v1284_v47  ;;  %1630 = vmatpush.msrb.mxu2 %v1319_v15  ;;  %v1379_v15 = vld [vmem:[#allocation8 + $0x6f0] sm:$0xff]  ;;  %v1372_v39 = vld [vmem:[#allocation8 + $0x6b8] sm:$0xff] }
 0x1aa   :  { %1664 = vmatpush.msra.mxu0 %v1216_v24  ;;  %v1050_v41 = vpop.f32.mrf.mxu2 }
 0x1ab   :  { %1684 = vmatpush.msra.mxu1 %v1280_v51  ;;  %1631 = vmatpush.msrb.mxu2 %v1315_v20  ;;  %v1051_v27 = vadd.f32 %v1050_v41, %v1031_v40  ;;  %v1371_v20 = vld [vmem:[#allocation8 + $0x6b0] sm:$0xff]  ;;  %v1368_v40 = vld [vmem:[#allocation8 + $0x698] sm:$0xff] }
 0x1ac   :  { %1665 = vmatpush.msra.mxu0 %v1212_v1  ;;  %v1360_v41 = vld [vmem:[#allocation8 + $0x658] sm:$0xff] }
 0x1ad   :  { %1685 = vmatpush.msra.mxu1 %v1276_v54  ;;  %1632 = vmatpush.msrb.mxu2 %v1311_v25  ;;  %v1344_v54 = vld [vmem:[#allocation8 + $0x5d8] sm:$0xff]  ;;  %v1359_v25 = vld [vmem:[#allocation8 + $0x650] sm:$0xff] }
 0x1ae   :  { %1666 = vmatpush.msra.mxu0 %v1208_v58  ;;  %v1336_v58 = vld [vmem:[#allocation8 + $0x598] sm:$0xff] }
 0x1af   :  { %1686 = vmatpush.msra.mxu1 %v1272_v56  ;;  %1633 = vmatpush.msrb.mxu2 %v1307_v30  ;;  %v1412_v30 = vld [vmem:[#allocation8 + $0x7f8] sm:$0xff] }
 0x1b0   :  { %1667 = vmatpush.msra.mxu0 %v1204_v61  ;;  %v1407_v61 = vld [vmem:[#allocation8 + $0x7d0] sm:$0xff] }
 0x1b1   :  { %1687 = vmatpush.msra.mxu1 %v1268_v7  ;;  %1634 = vmatpush.msrb.mxu2 %v1303_v34  ;;  %v1396_v34 = vld [vmem:[#allocation8 + $0x778] sm:$0xff] }
 0x1b2   :  { %1668 = vmatpush.msra.mxu0 %v1200_v3  ;;  %v1320_v3 = vld [vmem:[#allocation8 + $0x518] sm:$0xff] }
 0x1b3   :  { %1688 = vmatpush.msra.mxu1 %v1264_v62  ;;  %1635 = vmatpush.msrb.mxu2 %v1299_v37  ;;  %v1324_v62 = vld [vmem:[#allocation8 + $0x538] sm:$0xff] }
 0x1b4   :  { %1669 = vmatpush.msra.mxu0 %v1196_v8  ;;  %v1312_v8 = vld [vmem:[#allocation8 + $0x4d8] sm:$0xff] }
 0x1b5   :  { %1689 = vmatpush.msra.mxu1 %v1260_v5  ;;  %1636 = vmatpush.msrb.mxu2 %v1295_v19  ;;  %v1316_v5 = vld [vmem:[#allocation8 + $0x4f8] sm:$0xff] }
 0x1b6   :  { %1670 = vmatpush.msra.mxu0 %v1192_v12  ;;  %v1304_v12 = vld [vmem:[#allocation8 + $0x498] sm:$0xff] }
 0x1b7   :  { %1690 = vmatpush.msra.mxu1 %v1256_v10  ;;  %1637 = vmatpush.msrb.mxu2 %v1291_v44  ;;  %v1308_v10 = vld [vmem:[#allocation8 + $0x4b8] sm:$0xff]  ;;  %v1760_v44 = vld [vmem:[#allocation11 + $0x68] sm:$0xff] }
 0x1b8   :  { %1671 = vmatpush.msra.mxu0 %v1188_v16  ;;  %v1296_v16 = vld [vmem:[#allocation8 + $0x458] sm:$0xff] }
 0x1b9   :  { %1691 = vmatpush.msra.mxu1 %v1252_v14  ;;  %1638 = vmatpush.msrb.mxu2 %v1287_v49  ;;  %v1300_v14 = vld [vmem:[#allocation8 + $0x478] sm:$0xff] }
 0x1ba   :  { %1672 = vmatpush.msra.mxu0 %v1184_v21  ;;  %1639 = vmatmul.f32.vlgmr.msrb.gmra.mxu2 %v2271_v50  ;;  %v1288_v21 = vld [vmem:[#allocation8 + $0x418] sm:$0xff] }
 0x1bb   :  { %1692 = vmatpush.msra.mxu1 %v1248_v18  ;;  %1703 = vmatpush.msra.mxu2 %v1348_v52  ;;  %v1292_v18 = vld [vmem:[#allocation8 + $0x438] sm:$0xff]  ;;  %v1756_v52 = vld [vmem:[#allocation11 + $0x48] sm:$0xff] }
 0x1bc   :  { %1673 = vmatpush.msra.mxu0 %v1180_v26  ;;  %v1355_v26 = vld [vmem:[#allocation8 + $0x630] sm:$0xff]  ;;  %v1380_v37 = vld [vmem:[#allocation8 + $0x6f8] sm:$0xff] }
 0x1bd   :  { %1693 = vmatpush.msra.mxu1 %v1244_v23  ;;  %1704 = vmatpush.msra.mxu2 %v1344_v54  ;;  %v1363_v23 = vld [vmem:[#allocation8 + $0x670] sm:$0xff]  ;;  %v1356_v19 = vld [vmem:[#allocation8 + $0x638] sm:$0xff]  ;;  %v1775_v54 = vld [vmem:[#allocation11 + $0xe0] sm:$0xff] }
 0x1be   :  { %1674 = vmatpush.msra.mxu0 %v1176_v31  ;;  %v1408_v31 = vld [vmem:[#allocation8 + $0x7d8] sm:$0xff] }
 0x1bf   :  { %1694 = vmatpush.msra.mxu1 %v1240_v28  ;;  %1705 = vmatpush.msra.mxu2 %v1340_v29  ;;  %v1351_v28 = vld [vmem:[#allocation8 + $0x610] sm:$0xff] }
 0x1c0   :  { %1675 = vmatpush.msra.mxu0 %v1172_v35  ;;  %v1392_v35 = vld [vmem:[#allocation8 + $0x758] sm:$0xff] }
 0x1c1   :  { %1695 = vmatpush.msra.mxu1 %v1236_v32  ;;  %1706 = vmatpush.msra.mxu2 %v1336_v58  ;;  %v1404_v32 = vld [vmem:[#allocation8 + $0x7b8] sm:$0xff]  ;;  %v1772_v58 = vld [vmem:[#allocation11 + $0xc8] sm:$0xff] }
 0x1c2   :  { %1676 = vmatpush.msra.mxu0 %v1168_v38  ;;  %v1376_v38 = vld [vmem:[#allocation8 + $0x6d8] sm:$0xff] }
 0x1c3   :  { %1696 = vmatpush.msra.mxu1 %v1232_v36  ;;  %v1070_v45 = vpop.f32.mrf.mxu3  ;;  %v1090_v51 = vpop.f32.mrf.mxu0  ;;  %v1384_v36 = vld [vmem:[#allocation8 + $0x718] sm:$0xff] }
 0x1c4   :  { %1677 = vmatpush.msra.mxu0 %v1164_v42  ;;  %v1071_v47 = vadd.f32 %v1070_v45, %v1051_v27  ;;  %v1352_v42 = vld [vmem:[#allocation8 + $0x618] sm:$0xff] }
 0x1c5   :  { %1697 = vmatpush.msra.mxu1 %v1228_v63  ;;  %v1364_v63 = vld [vmem:[#allocation8 + $0x678] sm:$0xff] }
 0x1c6   :  { %1678 = vmatpush.msra.mxu0 %v1160_v0  ;;  %v1091_v24 = vadd.f32 %v1090_v51, %v1071_v47  ;;  %v1762_v27 = vld [vmem:[#allocation11 + $0x78] sm:$0xff]  ;;  %v1759_v0 = vld [vmem:[#allocation11 + $0x60] sm:$0xff]  ;;  %v1757_v49 = vld [vmem:[#allocation11 + $0x50] sm:$0xff] }
 0x1c7   :  { %1698 = vmatpush.msra.mxu1 %v1224_v43  ;;  %1679 = vmatmul.f32.vlgmr.msra.gmra.mxu0 %v2264_v48  ;;  %v1110_v53 = vpop.f32.mrf.mxu1  ;;  %v1411_v48 = vld [vmem:[#allocation8 + $0x7f0] sm:$0xff]  ;;  %v1758_v45 = vld [vmem:[#allocation11 + $0x58] sm:$0xff] }
 0x1c8   :  { %1699 = vmatmul.f32.vlgmr.msra.gmra.mxu1 %v2262_v46  ;;  %v1111_v55 = vadd.f32 %v1110_v53, %v1091_v24  ;;  %v1332_v46 = vld [vmem:[#allocation8 + $0x578] sm:$0xff]  ;;  %1815 = vmatpush.msrb.mxu0 %v1762_v27  ;;  %v1776_v24 = vld [vmem:[#allocation11 + $0xe8] sm:$0xff]  ;;  %v1755_v53 = vld [vmem:[#allocation11 + $0x40] sm:$0xff] }
 0x1c9   :  { %1707 = vmatpush.msra.mxu2 %v1332_v46  ;;  %v1761_v43 = vld [vmem:[#allocation11 + $0x70] sm:$0xff]  ;;  %v1778_v47 = vld [vmem:[#allocation11 + $0xf8] sm:$0xff]  ;;  %v1771_v46 = vld [vmem:[#allocation11 + $0xc0] sm:$0xff] }
 0x1ca   :  { %1816 = vmatpush.msrb.mxu0 %v1761_v43  ;;  %1835 = vmatpush.msrb.mxu1 %v1778_v47  ;;  %v1777_v51 = vld [vmem:[#allocation11 + $0xf0] sm:$0xff]  ;;  %v1810_v43 = vld [vmem:[#allocation11 + $0x1f8] sm:$0xff] }
 0x1cb   :  { %v1130_v1 = vpop.f32.mrf.mxu2  ;;  %1708 = vmatpush.msra.mxu2 %v1328_v60  ;;  %v1753_v29 = vld [vmem:[#allocation11 + $0x30] sm:$0xff] }
 0x1cc   :  { %v1131_v56 = vadd.f32 %v1130_v1, %v1111_v55  ;;  %1817 = vmatpush.msrb.mxu0 %v1760_v44  ;;  %1836 = vmatpush.msrb.mxu1 %v1777_v51  ;;  %v1754_v55 = vld [vmem:[#allocation11 + $0x38] sm:$0xff]  ;;  %v1749_v60 = vld [vmem:[#allocation11 + $0x10] sm:$0xff]  ;;  %v1807_v51 = vld [vmem:[#allocation11 + $0x1e0] sm:$0xff] }
 0x1cd   :  { %1709 = vmatpush.msra.mxu2 %v1324_v62  ;;  %v1774_v1 = vld [vmem:[#allocation11 + $0xd8] sm:$0xff]  ;;  %v1748_v62 = vld [vmem:[#allocation11 + $0x8] sm:$0xff]  ;;  %v1809_v44 = vld [vmem:[#allocation11 + $0x1f0] sm:$0xff] }
 0x1ce   :  { %v1150_v57 = vpop.f32.mrf.mxu3  ;;  %1818 = vmatpush.msrb.mxu0 %v1759_v0  ;;  %1837 = vmatpush.msrb.mxu1 %v1776_v24  ;;  %v1806_v24 = vld [vmem:[#allocation11 + $0x1d8] sm:$0xff] }
 0x1cf   :  { %v1151_v59 = vadd.f32 %v1150_v57, %v1131_v56  ;;  %1710 = vmatpush.msra.mxu2 %v1320_v3  ;;  %v1773_v56 = vld [vmem:[#allocation11 + $0xd0] sm:$0xff]  ;;  %v1752_v57 = vld [vmem:[#allocation11 + $0x28] sm:$0xff]  ;;  %v1747_v3 = vld [vmem:[#allocation11] sm:$0xff] }
 0x1d0   :  { %1819 = vmatpush.msrb.mxu0 %v1758_v45  ;;  %1838 = vmatpush.msrb.mxu1 %v1775_v54  ;;  %v1808_v45 = vld [vmem:[#allocation11 + $0x1e8] sm:$0xff] }
 0x1d1   :  { %v2281_v7 = vmax.f32 %v1151_v59, 0.0  ;;  %1711 = vmatpush.msra.mxu2 %v1316_v5  ;;  %v1751_v59 = vld [vmem:[#allocation11 + $0x20] sm:$0xff]  ;;  %v1794_v5 = vld [vmem:[#allocation11 + $0x178] sm:$0xff]  ;;  %v1804_v54 = vld [vmem:[#allocation11 + $0x1c8] sm:$0xff] }
 0x1d2   :  { %1820 = vmatpush.msrb.mxu0 %v1757_v49  ;;  %1839 = vmatpush.msrb.mxu1 %v1774_v1  ;;  %v1802_v1 = vld [vmem:[#allocation11 + $0x1b8] sm:$0xff] }
 0x1d3   :  { %1499 = vmatmul.f32.vlgmr.msrb.gmra.mxu3 %v2281_v7  ;;  %1712 = vmatpush.msra.mxu2 %v1312_v8  ;;  %v1766_v8 = vld [vmem:[#allocation11 + $0x98] sm:$0xff] }
 0x1d4   :  { %1643 = vmatpush.msrb.mxu3 %v1411_v48  ;;  %1821 = vmatpush.msrb.mxu0 %v1756_v52  ;;  %v1770_v48 = vld [vmem:[#allocation11 + $0xb8] sm:$0xff] }
 0x1d5   :  { %1713 = vmatpush.msra.mxu2 %v1308_v10  ;;  %1840 = vmatpush.msrb.mxu1 %v1773_v56  ;;  %v1792_v10 = vld [vmem:[#allocation11 + $0x168] sm:$0xff]  ;;  %v1801_v56 = vld [vmem:[#allocation11 + $0x1b0] sm:$0xff] }
 0x1d6   :  { %1644 = vmatpush.msrb.mxu3 %v1407_v61  ;;  %1822 = vmatpush.msrb.mxu0 %v1755_v53  ;;  %v1769_v61 = vld [vmem:[#allocation11 + $0xb0] sm:$0xff] }
 0x1d7   :  { %1714 = vmatpush.msra.mxu2 %v1304_v12  ;;  %1841 = vmatpush.msrb.mxu1 %v1772_v58  ;;  %v1791_v12 = vld [vmem:[#allocation11 + $0x160] sm:$0xff]  ;;  %v1805_v53 = vld [vmem:[#allocation11 + $0x1d0] sm:$0xff]  ;;  %v1800_v58 = vld [vmem:[#allocation11 + $0x1a8] sm:$0xff] }
 0x1d8   :  { %1645 = vmatpush.msrb.mxu3 %v1403_v2  ;;  %1823 = vmatpush.msrb.mxu0 %v1754_v55  ;;  %v1768_v2 = vld [vmem:[#allocation11 + $0xa8] sm:$0xff]  ;;  %v1803_v55 = vld [vmem:[#allocation11 + $0x1c0] sm:$0xff] }
 0x1d9   :  { %1715 = vmatpush.msra.mxu2 %v1300_v14  ;;  %1842 = vmatpush.msrb.mxu1 %v1771_v46  ;;  %v1790_v14 = vld [vmem:[#allocation11 + $0x158] sm:$0xff]  ;;  %v1799_v46 = vld [vmem:[#allocation11 + $0x1a0] sm:$0xff] }
 0x1da   :  { %1646 = vmatpush.msrb.mxu3 %v1399_v4  ;;  %1824 = vmatpush.msrb.mxu0 %v1753_v29  ;;  %v1767_v4 = vld [vmem:[#allocation11 + $0xa0] sm:$0xff] }
 0x1db   :  { %1579 = vmatmul.f32.vlgmr.msra.gmra.mxu3 %v2281_v7  ;;  %1716 = vmatpush.msra.mxu2 %v1296_v16  ;;  %v1788_v16 = vld [vmem:[#allocation11 + $0x148] sm:$0xff] }
 0x1dc   :  { %1647 = vmatpush.msrb.mxu3 %v1395_v6  ;;  %1825 = vmatpush.msrb.mxu0 %v1752_v57  ;;  %v1793_v6 = vld [vmem:[#allocation11 + $0x170] sm:$0xff] }
 0x1dd   :  { %1717 = vmatpush.msra.mxu2 %v1292_v18  ;;  %1843 = vmatpush.msrb.mxu1 %v1770_v48  ;;  %v2288_v18 = vld [vmem:[#allocation10] sm:$0xf] }
 0x1de   :  { %1648 = vmatpush.msrb.mxu3 %v1391_v9  ;;  %1826 = vmatpush.msrb.mxu0 %v1751_v59  ;;  %v1765_v9 = vld [vmem:[#allocation11 + $0x90] sm:$0xff]  ;;  %v1417_v29 = vperm.slane %v2288_v18, 2 }
 0x1df   :  { %1718 = vmatpush.msra.mxu2 %v1288_v21  ;;  %1844 = vmatpush.msrb.mxu1 %v1769_v61 }
 0x1e0   :  { %1649 = vmatpush.msrb.mxu3 %v1387_v11  ;;  %1719 = vmatmul.f32.vlgmr.msra.gmra.mxu2 %v2271_v50  ;;  %v1388_v50 = vld [vmem:[#allocation8 + $0x738] sm:$0xff]  ;;  %v1764_v11 = vld [vmem:[#allocation11 + $0x88] sm:$0xff] }
 0x1e1   :  { %1845 = vmatpush.msrb.mxu1 %v1768_v2  ;;  %1855 = vmatpush.msrb.mxu2 %v1794_v5 }
 0x1e2   :  { %1650 = vmatpush.msrb.mxu3 %v1383_v13  ;;  %v1763_v13 = vld [vmem:[#allocation11 + $0x80] sm:$0xff] }
 0x1e3   :  { %1846 = vmatpush.msrb.mxu1 %v1767_v4  ;;  %1856 = vmatpush.msrb.mxu2 %v1793_v6  ;;  %v1797_v4 = vld [vmem:[#allocation11 + $0x190] sm:$0xff]  ;;  %v1796_v6 = vld [vmem:[#allocation11 + $0x188] sm:$0xff] }
 0x1e4   :  { %1651 = vmatpush.msrb.mxu3 %v1379_v15  ;;  %v1789_v15 = vld [vmem:[#allocation11 + $0x150] sm:$0xff]  ;;  %v1440_v21 = vpop.f32.mrf.mxu0 }
 0x1e5   :  { %1847 = vmatpush.msrb.mxu1 %v1766_v8  ;;  %1857 = vmatpush.msrb.mxu2 %v1792_v10  ;;  %v1795_v8 = vld [vmem:[#allocation11 + $0x180] sm:$0xff] }
 0x1e6   :  { %1652 = vmatpush.msrb.mxu3 %v1375_v17  ;;  %v1787_v17 = vld [vmem:[#allocation11 + $0x140] sm:$0xff] }
 0x1e7   :  { %1848 = vmatpush.msrb.mxu1 %v1765_v9  ;;  %1858 = vmatpush.msrb.mxu2 %v1791_v12  ;;  %v1418_v9 = vperm.slane %v2288_v18, 3 }
 0x1e8   :  { %1653 = vmatpush.msrb.mxu3 %v1371_v20  ;;  %v1786_v20 = vld [vmem:[#allocation11 + $0x138] sm:$0xff] }
 0x1e9   :  { %1849 = vmatpush.msrb.mxu1 %v1764_v11  ;;  %1859 = vmatpush.msrb.mxu2 %v1790_v14 }
 0x1ea   :  { %1654 = vmatpush.msrb.mxu3 %v1367_v22  ;;  %v1415_v22 = vperm.slane %v2288_v18, 0 }
 0x1eb   :  { %1850 = vmatpush.msrb.mxu1 %v1763_v13  ;;  %1860 = vmatpush.msrb.mxu2 %v1789_v15 }
 0x1ec   :  { %1655 = vmatpush.msrb.mxu3 %v1363_v23  ;;  %v1785_v23 = vld [vmem:[#allocation11 + $0x130] sm:$0xff] }
 0x1ed   :  { %1861 = vmatpush.msrb.mxu2 %v1788_v16 }
 0x1ee   :  { %1656 = vmatpush.msrb.mxu3 %v1359_v25  ;;  %v1784_v25 = vld [vmem:[#allocation11 + $0x128] sm:$0xff] }
 0x1ef   :  { %1862 = vmatpush.msrb.mxu2 %v1787_v17 }
 0x1f0   :  { %1657 = vmatpush.msrb.mxu3 %v1355_v26  ;;  %v1460_v26 = vpop.f32.mrf.mxu1 }
 0x1f1   :  { %1863 = vmatpush.msrb.mxu2 %v1786_v20 }
 0x1f2   :  { %1658 = vmatpush.msrb.mxu3 %v1351_v28 }
 0x1f3   :  { %1659 = vmatmul.f32.vlgmr.msrb.gmra.mxu3 %v2281_v7  ;;  %1864 = vmatpush.msrb.mxu2 %v1785_v23 }
 0x1f4   :  { %1723 = vmatpush.msra.mxu3 %v1412_v30  ;;  %v1441_v30 = vadd.f32 %v1440_v21, %v1415_v22  ;;  %v1928_v21 = vld [vmem:[#allocation13] ss:$0 sm:$0xff] }
 0x1f5   :  { %1865 = vmatpush.msrb.mxu2 %v1784_v25 }
 0x1f6   :  { %1724 = vmatpush.msra.mxu3 %v1408_v31  ;;  %v1783_v31 = vld [vmem:[#allocation11 + $0x120] sm:$0xff] }
 0x1f7   :  { %1866 = vmatpush.msrb.mxu2 %v1783_v31 }
 0x1f8   :  { %1725 = vmatpush.msra.mxu3 %v1404_v32  ;;  %v1461_v32 = vadd.f32 %v1460_v26, %v1441_v30 }
 0x1fa   :  { %1726 = vmatpush.msra.mxu3 %v1400_v33  ;;  %v1416_v33 = vperm.slane %v2288_v18, 1 }
 0x1fc   :  { %1727 = vmatpush.msra.mxu3 %v1396_v34  ;;  %v1782_v34 = vld [vmem:[#allocation11 + $0x118] sm:$0xff] }
 0x1fd   :  { %1867 = vmatpush.msrb.mxu2 %v1782_v34 }
 0x1fe   :  { %1728 = vmatpush.msra.mxu3 %v1392_v35 }
 0x200   :  { %1729 = vmatpush.msra.mxu3 %v1388_v50 }
 0x202   :  { %1730 = vmatpush.msra.mxu3 %v1384_v36 }
 0x204   :  { %1731 = vmatpush.msra.mxu3 %v1380_v37  ;;  %v1520_v35 = vpop.f32.mrf.mxu0 }
 0x205   :  { %v1521_v37 = vadd.f32 %v1520_v35, %v1416_v33 }
 0x206   :  { %1732 = vmatpush.msra.mxu3 %v1376_v38 }
 0x208   :  { %1733 = vmatpush.msra.mxu3 %v1372_v39  ;;  %v1781_v39 = vld [vmem:[#allocation11 + $0x110] sm:$0xff] }
 0x209   :  { %1868 = vmatpush.msrb.mxu2 %v1781_v39 }
 0x20a   :  { %1734 = vmatpush.msra.mxu3 %v1368_v40 }
 0x20c   :  { %1735 = vmatpush.msra.mxu3 %v1364_v63  ;;  %v1780_v63 = vld [vmem:[#allocation11 + $0x108] sm:$0xff] }
 0x20d   :  { %1869 = vmatpush.msrb.mxu2 %v1780_v63 }
 0x20e   :  { %1736 = vmatpush.msra.mxu3 %v1360_v41  ;;  %v1540_v41 = vpop.f32.mrf.mxu1 }
 0x20f   :  { %v1541_v27 = vadd.f32 %v1540_v41, %v1521_v37 }
 0x210   :  { %1737 = vmatpush.msra.mxu3 %v1356_v19 }
 0x212   :  { %1738 = vmatpush.msra.mxu3 %v1352_v42  ;;  %v1779_v42 = vld [vmem:[#allocation11 + $0x100] sm:$0xff] }
 0x213   :  { %1739 = vmatmul.f32.vlgmr.msra.gmra.mxu3 %v2281_v7  ;;  %v1750_v7 = vld [vmem:[#allocation11 + $0x18] sm:$0xff]  ;;  %1870 = vmatpush.msrb.mxu2 %v1779_v42 }
 0x214   :  { %1827 = vmatpush.msrb.mxu0 %v1750_v7  ;;  %1875 = vmatpush.msrb.mxu3 %v1810_v43  ;;  %v1798_v7 = vld [vmem:[#allocation11 + $0x198] sm:$0xff] }
 0x216   :  { %1828 = vmatpush.msrb.mxu0 %v1749_v60  ;;  %1876 = vmatpush.msrb.mxu3 %v1809_v44 }
 0x218   :  { %1829 = vmatpush.msrb.mxu0 %v1748_v62  ;;  %1877 = vmatpush.msrb.mxu3 %v1808_v45 }
 0x21a   :  { %1830 = vmatpush.msrb.mxu0 %v1747_v3  ;;  %1878 = vmatpush.msrb.mxu3 %v1807_v51 }
 0x21c   :  { %v1480_v28 = vpop.f32.mrf.mxu2  ;;  %1879 = vmatpush.msrb.mxu3 %v1806_v24 }
 0x21d   :  { %v1481_v50 = vadd.f32 %v1480_v28, %v1461_v32 }
 0x21e   :  { %1880 = vmatpush.msrb.mxu3 %v1805_v53 }
 0x220   :  { %1881 = vmatpush.msrb.mxu3 %v1804_v54 }
 0x222   :  { %1882 = vmatpush.msrb.mxu3 %v1803_v55 }
 0x224   :  { %v1560_v19 = vpop.f32.mrf.mxu2  ;;  %v1600_v57 = vpop.f32.mrf.mxu0  ;;  %1883 = vmatpush.msrb.mxu3 %v1802_v1 }
 0x225   :  { %v1561_v0 = vadd.f32 %v1560_v19, %v1541_v27  ;;  %v1601_v59 = vadd.f32 %v1600_v57, %v1417_v29  ;;  %v1620_v48 = vpop.f32.mrf.mxu1 }
 0x226   :  { %1884 = vmatpush.msrb.mxu3 %v1801_v56 }
 0x227   :  { %v1621_v61 = vadd.f32 %v1620_v48, %v1601_v59 }
 0x228   :  { %1885 = vmatpush.msrb.mxu3 %v1800_v58 }
 0x22a   :  { %1886 = vmatpush.msrb.mxu3 %v1799_v46 }
 0x22c   :  { %1887 = vmatpush.msrb.mxu3 %v1798_v7 }
 0x22e   :  { %1888 = vmatpush.msrb.mxu3 %v1797_v4 }
 0x230   :  { %1889 = vmatpush.msrb.mxu3 %v1796_v6 }
 0x232   :  { %1890 = vmatpush.msrb.mxu3 %v1795_v8 }
 0x23d   :  { %v1640_v60 = vpop.f32.mrf.mxu2 }
 0x23e   :  { %v1641_v62 = vadd.f32 %v1640_v60, %v1621_v61 }
 0x244   :  { %v1680_v10 = vpop.f32.mrf.mxu0 }
 0x245   :  { %v1681_v11 = vadd.f32 %v1680_v10, %v1418_v9  ;;  %v1700_v12 = vpop.f32.mrf.mxu1 }
 0x247   :  { %v1701_v14 = vadd.f32 %v1700_v12, %v1681_v11 }
 0x256   :  { %v1500_v36 = vpop.f32.mrf.mxu3 }
 0x257   :  { %v1501_v38 = vadd.f32 %v1500_v36, %v1481_v50 }
 0x259   :  { %v1743_v40 = vmax.f32 %v1501_v38, 0.0 }
 0x25b   :  { %1831 = vmatmul.f32.vlgmr.msrb.gmra.mxu0 %v1743_v40 }
 0x25e   :  { %v1580_v47 = vpop.f32.mrf.mxu3 }
 0x25f   :  { %v1581_v49 = vadd.f32 %v1580_v47, %v1561_v0 }
 0x261   :  { %v1744_v52 = vmax.f32 %v1581_v49, 0.0 }
 0x263   :  { %1851 = vmatmul.f32.vlgmr.msrb.gmra.mxu1 %v1744_v52  ;;  %v1720_v13 = vpop.f32.mrf.mxu2 }
 0x264   :  { %v1721_v15 = vadd.f32 %v1720_v13, %v1701_v14 }
 0x276   :  { %v1660_v2 = vpop.f32.mrf.mxu3 }
 0x277   :  { %v1661_v3 = vadd.f32 %v1660_v2, %v1641_v62 }
 0x279   :  { %v1745_v5 = vmax.f32 %v1661_v3, 0.0 }
 0x27b   :  { %1871 = vmatmul.f32.vlgmr.msrb.gmra.mxu2 %v1745_v5 }
 0x296   :  { %v1740_v16 = vpop.f32.mrf.mxu3 }
 0x297   :  { %v1741_v17 = vadd.f32 %v1740_v16, %v1721_v15 }
 0x299   :  { %v1746_v20 = vmax.f32 %v1741_v17, 0.0 }
 0x29b   :  { %1891 = vmatmul.f32.vlgmr.msrb.gmra.mxu3 %v1746_v20 }
 0x2d8   :  { %v1832_v22 = vpop.f32.mrf.mxu0 }
 0x2d9   :  { %v1833_v25 = vadd.f32 %v1928_v21, %v1832_v22 }
 0x2e0   :  { %v1852_v23 = vpop.f32.mrf.mxu1 }
 0x2e1   :  { %v1853_v28 = vadd.f32 %v1852_v23, %v1833_v25 }
 0x2fe   :  { %v1872_v26 = vpop.f32.mrf.mxu2 }
 0x2ff   :  { %v1873_v18 = vadd.f32 %v1872_v26, %v1853_v28 }
 0x31e   :  { %v1892_v30 = vpop.f32.mrf.mxu3 }
 0x31f   :  { %v1893_v31 = vadd.f32 %v1892_v30, %v1873_v18 }
 0x321   :  { %1895 = vst [vmem:[#allocation14] sm:$0xff] %v1893_v31 }
 0x322   :  { %1906 = dma.vmem_to_hbm [thread:$0]  %s1902_s6, 128, %s1904_s14, [#allocation4]  }
 0x323   :  { %2136 = dma.done.wait [#allocation4], 128  }
 0x324   :  { %2137 = vsyncadd [#allocation4], 4294967168 }
 0x325   :  { %1911 = vsyncpa [#allocation3], 1 }
 0x326   :  { %1912 = vsyncpa [#allocation6], 1 }
 0x327   :  { %1913 = vsyncpa [#allocation9], 1 }
 0x328   :  { %1914 = vsyncpa [#allocation12], 1 }
 0x329   :  { %1915 = vsyncpa [#allocation4], 1 }

</bundles_post_ra>
